<compile_context>
chip_gen: v7x
topology: tpu7x:2x2x1
jax: 0.10.0
libtpu: 0.0.40
codegen_flags: <defaults>
</compile_context>

<pallas_src>
import functools
import math

import jax
import jax.numpy as jnp
from jax.experimental import pallas as pl
from jax.experimental.pallas import tpu as pltpu

MASK_NEG = -1e9  # finite "minus infinity": avoids exp(-inf - -inf) = NaN


# ----------------------------- kernel helpers -----------------------------

def _layer_norm(x, g, b, eps):
    mu = jnp.mean(x, axis=-1, keepdims=True)
    var = jnp.mean((x - mu) ** 2, axis=-1, keepdims=True)
    return (x - mu) * jax.lax.rsqrt(var + eps) * g + b


def _gelu_tanh(x):
    c = math.sqrt(2.0 / math.pi)
    return 0.5 * x * (1.0 + jnp.tanh(c * (x + 0.044715 * x * x * x)))


# ------------------------------ Pallas kernel ------------------------------

def bert_encoder_kernel(x_ref, mask_ref,
                        wqkv_ref, bqkv_ref, wo_ref,
                        w1_ref, b1_ref, w2_ref, vecs_ref,
                        out_ref, h_ref, *, num_heads, eps, batch_tile, seq_len):
    """Grid = (batch_group, layer).  h_ref carries (batch_tile*S, H) activations
    across the (innermost, "arbitrary") layer axis."""
    layer = pl.program_id(1)
    H = h_ref.shape[-1]
    hd = H // num_heads
    R = batch_tile * seq_len
    bf16 = jnp.bfloat16

    @pl.when(layer == 0)
    def _():
        h_ref[...] = x_ref[...].reshape(R, H)

    x = h_ref[...]                                   # (R, H) f32 carried activation
    xb = x.astype(bf16)

    # Fused QKV projection: bf16 operands, f32 accumulation.  The 1/sqrt(hd)
    # scale was folded into the Q columns/bias by the wrapper.
    qkv = jnp.dot(xb, wqkv_ref[0], preferred_element_type=jnp.float32) + bqkv_ref[0]
    q, k, v = qkv[:, :H], qkv[:, H:2 * H], qkv[:, 2 * H:]

    # Additive mask over keys, computed once per grid step: (batch_tile, 1, S).
    add_mask = jnp.where(mask_ref[...] == 0.0, MASK_NEG, 0.0)

    def to_heads(t):                                 # (S, H) f32 -> (nh, S, hd) bf16
        return jnp.transpose(t.reshape(seq_len, num_heads, hd), (1, 0, 2)).astype(bf16)

    # Attention is per batch element (static unrolled loop over batch_tile);
    # heads are batched in the dot_general batch dim.
    ctx_parts = []
    for b in range(batch_tile):
        r0, r1 = b * seq_len, (b + 1) * seq_len
        qh, kh, vh = to_heads(q[r0:r1]), to_heads(k[r0:r1]), to_heads(v[r0:r1])
        s = jnp.einsum('hqd,hkd->hqk', qh, kh,
                       preferred_element_type=jnp.float32)            # (nh, S, S)
        s = s + add_mask[b][None, :, :]
        smax = jnp.max(s, axis=-1, keepdims=True)
        e = jnp.exp(s - smax)                                          # f32
        denom = jnp.sum(e, axis=-1, keepdims=True)                     # (nh, S, 1)
        ctxb = jnp.einsum('hqk,hkd->hqd', e.astype(bf16), vh,
                          preferred_element_type=jnp.float32)          # (nh, S, hd)
        # Deferred softmax normalization on the (S, hd) result (EUP reciprocal).
        ctxb = ctxb * pl.reciprocal(denom, approx=True)
        ctx_parts.append(jnp.transpose(ctxb, (1, 0, 2)).reshape(seq_len, H))
    ctx = ctx_parts[0] if batch_tile == 1 else jnp.concatenate(ctx_parts, axis=0)

    # Packed per-layer vectors: [bo, ln1g, ln1b, b2, ln2g, ln2b]  (6, H) f32.
    vecs = vecs_ref[0]

    # Output projection + residual + LayerNorm (f32).
    attn = jnp.dot(ctx.astype(bf16), wo_ref[0],
                   preferred_element_type=jnp.float32) + vecs[0:1]
    h1 = _layer_norm(attn + x, vecs[1:2], vecs[2:3], eps)

    # FFN: Linear -> GELU(tanh) -> Linear, residual + LayerNorm (f32 elementwise).
    inter = _gelu_tanh(jnp.dot(h1.astype(bf16), w1_ref[0],
                               preferred_element_type=jnp.float32) + b1_ref[0])
    ffn = jnp.dot(inter.astype(bf16), w2_ref[0],
                  preferred_element_type=jnp.float32) + vecs[3:4]
    h2 = _layer_norm(ffn + h1, vecs[4:5], vecs[5:6], eps)

    h_ref[...] = h2                                  # carry to next layer

    @pl.when(layer == pl.num_programs(1) - 1)
    def _():
        out_ref[...] = h2.reshape(batch_tile, seq_len, H)


# ------------------------------ python wrapper ------------------------------

def bert_encoder_forward(x, mask, layer_params, num_heads, eps=1e-12,
                         batch_tile=None):
    """x: (B, S, H) f32.  mask: (B, 1, S) f32 of {0., 1.} (1 = attend)."""
    B, S, H = x.shape
    L = len(layer_params)
    M = layer_params[0]["w1"].shape[1]
    hd = H // num_heads
    scale = 1.0 / math.sqrt(hd)

    if batch_tile is None:
        batch_tile = B            # fold the whole batch: weights stream once/layer
    assert B % batch_tile == 0
    R = batch_tile * S

    bf16, f32 = jnp.bfloat16, jnp.float32

    # Fused/stacked weights: matrices bf16 (MXU-native, halves DMA/VMEM),
    # vectors f32.  Score scale folded into Q columns/bias.
    wqkv = jnp.stack([jnp.concatenate([p["wq"] * scale, p["wk"], p["wv"]], axis=1)
                      for p in layer_params]).astype(bf16)              # (L, H, 3H)
    bqkv = jnp.stack([jnp.concatenate([p["bq"] * scale, p["bk"], p["bv"]], axis=1)
                      for p in layer_params]).astype(f32)               # (L, 1, 3H)
    wo = jnp.stack([p["wo"] for p in layer_params]).astype(bf16)        # (L, H, H)
    w1 = jnp.stack([p["w1"] for p in layer_params]).astype(bf16)        # (L, H, M)
    b1 = jnp.stack([p["b1"] for p in layer_params]).astype(f32)         # (L, 1, M)
    w2 = jnp.stack([p["w2"] for p in layer_params]).astype(bf16)        # (L, M, H)
    vecs = jnp.stack([jnp.concatenate([p["bo"], p["ln1g"], p["ln1b"],
                                       p["b2"], p["ln2g"], p["ln2b"]], axis=0)
                      for p in layer_params]).astype(f32)               # (L, 6, H)

    def wspec(shape):
        zeros = (0,) * len(shape)
        return pl.BlockSpec((1,) + shape, lambda g, l: (l,) + zeros)

    in_specs = [
        pl.BlockSpec((batch_tile, S, H), lambda g, l: (g, 0, 0)),   # hidden_states
        pl.BlockSpec((batch_tile, 1, S), lambda g, l: (g, 0, 0)),   # attention mask
        wspec((H, 3 * H)), wspec((1, 3 * H)),                       # fused QKV
        wspec((H, H)),                                              # attention dense
        wspec((H, M)), wspec((1, M)),                               # FFN intermediate
        wspec((M, H)),                                              # FFN out
        wspec((6, H)),                                              # packed bias/LN slab
    ]

    # Explicit VMEM budget: double-buffered per-layer weight + activation blocks
    # plus in-kernel intermediates, capped at ~75% of this generation's VMEM.
    w_bytes = (4 * H * H + 2 * H * M) * 2 + (9 * H + M) * 4     # bf16 mats + f32 vecs
    act_bytes = (2 * R * H + batch_tile * S) * 4                # x, out, mask blocks
    interm_bytes = (3 * R * H + 2 * num_heads * S * S + R * M + 8 * R * H) * 4
    budget = 2 * (w_bytes + act_bytes) + R * H * 4 + interm_bytes + (4 << 20)
    try:
        vmem_cap = pltpu.get_tpu_info().vmem_capacity_bytes
    except Exception:
        vmem_cap = 128 << 20
    vmem_limit = int(min(max(budget, 16 << 20), int(0.75 * vmem_cap)))

    kernel = functools.partial(bert_encoder_kernel, num_heads=num_heads, eps=eps,
                               batch_tile=batch_tile, seq_len=S)
    return pl.pallas_call(
        kernel,
        out_shape=jax.ShapeDtypeStruct((B, S, H), jnp.float32),
        grid_spec=pltpu.PrefetchScalarGridSpec(
            num_scalar_prefetch=0,
            grid=(B // batch_tile, L),                 # layer axis innermost
            in_specs=in_specs,
            out_specs=pl.BlockSpec((batch_tile, S, H), lambda g, l: (g, 0, 0)),
            scratch_shapes=[pltpu.VMEM((R, H), jnp.float32)],
        ),
        compiler_params=pltpu.CompilerParams(
            dimension_semantics=("parallel", "arbitrary"),
            vmem_limit_bytes=vmem_limit,
        ),
    )(x, mask, wqkv, bqkv, wo, w1, b1, w2, vecs)


# --------------------------- pure-JAX reference -----------------------------

def bert_encoder_reference(x, mask, layer_params, num_heads, eps=1e-12):
    B, S, H = x.shape
    hd = H // num_heads
    add_mask = jnp.where(mask == 0.0, MASK_NEG, 0.0)[:, :, None, :]   # (B,1,1,S)

    def ln(t, g, b):
        mu = jnp.mean(t, axis=-1, keepdims=True)
        var = jnp.mean((t - mu) ** 2, axis=-1, keepdims=True)
        return (t - mu) / jnp.sqrt(var + eps) * g + b

    for p in layer_params:
        q = (x @ p["wq"] + p["bq"]).reshape(B, S, num_heads, hd).transpose(0, 2, 1, 3)
        k = (x @ p["wk"] + p["bk"]).reshape(B, S, num_heads, hd).transpose(0, 2, 1, 3)
        v = (x @ p["wv"] + p["bv"]).reshape(B, S, num_heads, hd).transpose(0, 2, 1, 3)
        scores = (q @ k.transpose(0, 1, 3, 2)) / math.sqrt(hd) + add_mask
        probs = jax.nn.softmax(scores, axis=-1)
        ctx = (probs @ v).transpose(0, 2, 1, 3).reshape(B, S, H)
        attn_out = ctx @ p["wo"] + p["bo"]
        h1 = ln(attn_out + x, p["ln1g"], p["ln1b"])
        inter = jax.nn.gelu(h1 @ p["w1"] + p["b1"], approximate=True)
        ffn = inter @ p["w2"] + p["b2"]
        x = ln(ffn + h1, p["ln2g"], p["ln2b"])
    return x


# ------------------------------- param init --------------------------------

def init_layer_params(key, H, M):
    ks = jax.random.split(key, 12)
    s = 0.02
    return dict(
        wq=jax.random.normal(ks[0], (H, H), jnp.float32) * s,
        bq=jax.random.normal(ks[1], (1, H), jnp.float32) * 0.01,
        wk=jax.random.normal(ks[2], (H, H), jnp.float32) * s,
        bk=jax.random.normal(ks[3], (1, H), jnp.float32) * 0.01,
        wv=jax.random.normal(ks[4], (H, H), jnp.float32) * s,
        bv=jax.random.normal(ks[5], (1, H), jnp.float32) * 0.01,
        wo=jax.random.normal(ks[6], (H, H), jnp.float32) * s,
        bo=jax.random.normal(ks[7], (1, H), jnp.float32) * 0.01,
        ln1g=jnp.ones((1, H), jnp.float32),
        ln1b=jnp.zeros((1, H), jnp.float32),
        w1=jax.random.normal(ks[8], (H, M), jnp.float32) * s,
        b1=jax.random.normal(ks[9], (1, M), jnp.float32) * 0.01,
        w2=jax.random.normal(ks[10], (M, H), jnp.float32) * s,
        b2=jax.random.normal(ks[11], (1, H), jnp.float32) * 0.01,
        ln2g=jnp.ones((1, H), jnp.float32),
        ln2b=jnp.zeros((1, H), jnp.float32),
    )


# ---------------------------------- main ------------------------------------

if __name__ == "__main__":
    # small BertConfig analogue: hidden_dim=32, num_heads=4, fcnn_middle_dim=64,
    # num_encoder_layers=2, layer_norm_eps=1e-12
    B, S, H, NUM_HEADS, M, NUM_LAYERS = 2, 8, 32, 4, 64, 2
    EPS = 1e-12

    key = jax.random.PRNGKey(0)
    kx, *kls = jax.random.split(key, NUM_LAYERS + 1)

    hidden_states = jax.random.normal(kx, (B, S, H), jnp.float32)

    # attention mask: 1 = attend, 0 = masked (pad). second batch has 2 pad tokens.
    mask = jnp.ones((B, S), jnp.float32).at[1, 6:].set(0.0)
    mask3 = mask[:, None, :]                         # (B, 1, S)

    layer_params = [init_layer_params(k, H, M) for k in kls]

    out = bert_encoder_forward(hidden_states, mask3, layer_params, NUM_HEADS, EPS)
    out = jax.block_until_ready(out)

    ref = bert_encoder_reference(hidden_states, mask3, layer_params, NUM_HEADS, EPS)
    assert out.shape == (B, S, H)
    # Kernel runs matmuls with bf16 operands (f32 accumulation); reference is pure
    # f32, so use a bf16-appropriate tolerance.
    assert jnp.allclose(out, ref, rtol=1e-2, atol=1e-2), "mismatch vs pure-JAX reference"

    print("KERNEL_OK")
</pallas_src>

<mosaic_0001>
module attributes {stable_mosaic.version = 11 : i64} {
  func.func @bert_encoder_kernel(%arg0: i32, %arg1: i32, %arg2: memref<2x8x32xf32, #tpu.memory_space<vmem>>, %arg3: memref<2x1x8xf32, #tpu.memory_space<vmem>>, %arg4: memref<1x32x96xbf16, #tpu.memory_space<vmem>>, %arg5: memref<1x1x96xf32, #tpu.memory_space<vmem>>, %arg6: memref<1x32x32xbf16, #tpu.memory_space<vmem>>, %arg7: memref<1x32x64xbf16, #tpu.memory_space<vmem>>, %arg8: memref<1x1x64xf32, #tpu.memory_space<vmem>>, %arg9: memref<1x64x32xbf16, #tpu.memory_space<vmem>>, %arg10: memref<1x6x32xf32, #tpu.memory_space<vmem>>, %arg11: memref<2x8x32xf32, #tpu.memory_space<vmem>>, %arg12: memref<16x32xf32, #tpu.memory_space<vmem>>) attributes {dimension_semantics = [#tpu.dimension_semantics<parallel>, #tpu.dimension_semantics<arbitrary>], iteration_bounds = array<i64: 1, 2>, scalar_prefetch = 0 : i64, scratch_operands = 1 : i64, tpu.core_type = #tpu.core_type<tc>, window_params = [{transform_indices = @transform_0, window_bounds = array<i64: 2, 8, 32>}, {transform_indices = @transform_1, window_bounds = array<i64: 2, 1, 8>}, {transform_indices = @transform_2, window_bounds = array<i64: 1, 32, 96>}, {transform_indices = @transform_3, window_bounds = array<i64: 1, 1, 96>}, {transform_indices = @transform_4, window_bounds = array<i64: 1, 32, 32>}, {transform_indices = @transform_5, window_bounds = array<i64: 1, 32, 64>}, {transform_indices = @transform_6, window_bounds = array<i64: 1, 1, 64>}, {transform_indices = @transform_7, window_bounds = array<i64: 1, 64, 32>}, {transform_indices = @transform_8, window_bounds = array<i64: 1, 6, 32>}, {transform_indices = @transform_9, window_bounds = array<i64: 2, 8, 32>}]} {
    %c0_i32 = arith.constant 0 : i32
    %0 = arith.cmpi eq, %arg1, %c0_i32 : i32
    %1 = arith.extui %0 : i1 to i32
    %c0_i32_0 = arith.constant 0 : i32
    %2 = arith.cmpi ne, %1, %c0_i32_0 : i32
    scf.if %2 {
      %c0_57 = arith.constant 0 : index
      %c0_58 = arith.constant 0 : index
      %c0_59 = arith.constant 0 : index
      %177 = vector.load %arg2[%c0_57, %c0_58, %c0_59] : memref<2x8x32xf32, #tpu.memory_space<vmem>>, vector<2x8x32xf32>
      %178 = vector.shape_cast %177 : vector<2x8x32xf32> to vector<16x32xf32>
      %c0_60 = arith.constant 0 : index
      %c0_61 = arith.constant 0 : index
      %179 = vector.load %arg12[%c0_60, %c0_61] : memref<16x32xf32, #tpu.memory_space<vmem>>, vector<16x32xf32>
      tpu.vector_store %arg12[%c0_60, %c0_61], %178 {strides = array<i32>} : memref<16x32xf32, #tpu.memory_space<vmem>>, vector<16x32xf32>,
    } else {
    }
    %c0 = arith.constant 0 : index
    %c0_1 = arith.constant 0 : index
    %3 = vector.load %arg12[%c0, %c0_1] : memref<16x32xf32, #tpu.memory_space<vmem>>, vector<16x32xf32>
    %4 = arith.truncf %3 : vector<16x32xf32> to vector<16x32xbf16>
    %c0_2 = arith.constant 0 : index
    %c0_3 = arith.constant 0 : index
    %c0_4 = arith.constant 0 : index
    %5 = vector.load %arg4[%c0_2, %c0_3, %c0_4] : memref<1x32x96xbf16, #tpu.memory_space<vmem>>, vector<1x32x96xbf16>
    %6 = vector.shape_cast %5 : vector<1x32x96xbf16> to vector<32x96xbf16>
    %cst = arith.constant dense<0.000000e+00> : vector<16x96xf32>
    %7 = tpu.matmul %4, %6, %cst {dimension_numbers = #tpu.dot_dimension_numbers<[1], [0], [0], [1], [0, 0, 1, 1], [], []>} : vector<16x32xbf16>, vector<32x96xbf16>, vector<16x96xf32> -> vector<16x96xf32>
    %c0_5 = arith.constant 0 : index
    %c0_6 = arith.constant 0 : index
    %c0_7 = arith.constant 0 : index
    %8 = vector.load %arg5[%c0_5, %c0_6, %c0_7] : memref<1x1x96xf32, #tpu.memory_space<vmem>>, vector<1x1x96xf32>
    %9 = vector.shape_cast %8 : vector<1x1x96xf32> to vector<1x96xf32>
    %10 = vector.broadcast %9 : vector<1x96xf32> to vector<16x96xf32>
    %11 = arith.addf %7, %10 : vector<16x96xf32>
    %12 = vector.extract_strided_slice %11 {offsets = [0, 0], sizes = [16, 32], strides = [1, 1]} : vector<16x96xf32> to vector<16x32xf32>
    %13 = vector.extract_strided_slice %11 {offsets = [0, 32], sizes = [16, 32], strides = [1, 1]} : vector<16x96xf32> to vector<16x32xf32>
    %14 = vector.extract_strided_slice %11 {offsets = [0, 64], sizes = [16, 32], strides = [1, 1]} : vector<16x96xf32> to vector<16x32xf32>
    %c0_8 = arith.constant 0 : index
    %c0_9 = arith.constant 0 : index
    %c0_10 = arith.constant 0 : index
    %15 = vector.load %arg3[%c0_8, %c0_9, %c0_10] : memref<2x1x8xf32, #tpu.memory_space<vmem>>, vector<2x1x8xf32>
    %cst_11 = arith.constant 0.000000e+00 : f32
    %16 = vector.broadcast %cst_11 : f32 to vector<2x1x8xf32>
    %17 = arith.cmpf oeq, %15, %16 : vector<2x1x8xf32>
    %cst_12 = arith.constant -1.000000e+09 : f32
    %cst_13 = arith.constant 0.000000e+00 : f32
    %18 = vector.broadcast %cst_12 : f32 to vector<2x1x8xf32>
    %19 = vector.broadcast %cst_13 : f32 to vector<2x1x8xf32>
    %20 = arith.select %17, %18, %19 : vector<2x1x8xi1>, vector<2x1x8xf32>
    %21 = vector.extract_strided_slice %12 {offsets = [0, 0], sizes = [8, 32], strides = [1, 1]} : vector<16x32xf32> to vector<8x32xf32>
    %22 = vector.shape_cast %21 : vector<8x32xf32> to vector<8x4x8xf32>
    %23 = tpu.transpose %22, [1, 0, 2] : vector<8x4x8xf32> -> vector<4x8x8xf32>
    %24 = arith.truncf %23 : vector<4x8x8xf32> to vector<4x8x8xbf16>
    %25 = vector.extract_strided_slice %13 {offsets = [0, 0], sizes = [8, 32], strides = [1, 1]} : vector<16x32xf32> to vector<8x32xf32>
    %26 = vector.shape_cast %25 : vector<8x32xf32> to vector<8x4x8xf32>
    %27 = tpu.transpose %26, [1, 0, 2] : vector<8x4x8xf32> -> vector<4x8x8xf32>
    %28 = arith.truncf %27 : vector<4x8x8xf32> to vector<4x8x8xbf16>
    %29 = vector.extract_strided_slice %14 {offsets = [0, 0], sizes = [8, 32], strides = [1, 1]} : vector<16x32xf32> to vector<8x32xf32>
    %30 = vector.shape_cast %29 : vector<8x32xf32> to vector<8x4x8xf32>
    %31 = tpu.transpose %30, [1, 0, 2] : vector<8x4x8xf32> -> vector<4x8x8xf32>
    %32 = arith.truncf %31 : vector<4x8x8xf32> to vector<4x8x8xbf16>
    "tpu.trace_start"() <{level = 10 : i32, message = "hqd,hkd->hqk"}> : () -> ()
    %cst_14 = arith.constant dense<0.000000e+00> : vector<4x8x8xf32>
    %33 = tpu.matmul %24, %28, %cst_14 {dimension_numbers = #tpu.dot_dimension_numbers<[2], [2], [1], [1], [0, 0, 0, 1, 1, 1], [0], [0]>} : vector<4x8x8xbf16>, vector<4x8x8xbf16>, vector<4x8x8xf32> -> vector<4x8x8xf32>
    "tpu.trace_stop"() : () -> ()
    %34 = vector.extract_strided_slice %20 {offsets = [0, 0, 0], sizes = [1, 1, 8], strides = [1, 1, 1]} : vector<2x1x8xf32> to vector<1x1x8xf32>
    %35 = vector.shape_cast %34 : vector<1x1x8xf32> to vector<1x8xf32>
    %36 = vector.shape_cast %35 : vector<1x8xf32> to vector<1x1x8xf32>
    %37 = vector.broadcast %36 : vector<1x1x8xf32> to vector<4x8x8xf32>
    %38 = arith.addf %33, %37 : vector<4x8x8xf32>
    %cst_15 = arith.constant dense<0xFF800000> : vector<4x8xf32>
    %39 = vector.multi_reduction <maximumf>, %38, %cst_15 [2] : vector<4x8x8xf32> to vector<4x8xf32>
    %40 = vector.shape_cast %39 : vector<4x8xf32> to vector<4x8x1xf32>
    %41 = vector.broadcast %40 : vector<4x8x1xf32> to vector<4x8x8xf32>
    %42 = arith.subf %38, %41 : vector<4x8x8xf32>
    %43 = math.exp %42 : vector<4x8x8xf32>
    %cst_16 = arith.constant dense<0.000000e+00> : vector<4x8xf32>
    %44 = vector.multi_reduction <add>, %43, %cst_16 [2] : vector<4x8x8xf32> to vector<4x8xf32>
    %45 = vector.shape_cast %44 : vector<4x8xf32> to vector<4x8x1xf32>
    %46 = arith.truncf %43 : vector<4x8x8xf32> to vector<4x8x8xbf16>
    "tpu.trace_start"() <{level = 10 : i32, message = "hqk,hkd->hqd"}> : () -> ()
    %cst_17 = arith.constant dense<0.000000e+00> : vector<4x8x8xf32>
    %47 = tpu.matmul %46, %32, %cst_17 {dimension_numbers = #tpu.dot_dimension_numbers<[2], [1], [1], [2], [0, 0, 0, 1, 1, 2], [0], [0]>} : vector<4x8x8xbf16>, vector<4x8x8xbf16>, vector<4x8x8xf32> -> vector<4x8x8xf32>
    "tpu.trace_stop"() : () -> ()
    %48 = tpu.reciprocal %45 {approx = true} : vector<4x8x1xf32> -> vector<4x8x1xf32>
    %49 = vector.broadcast %48 : vector<4x8x1xf32> to vector<4x8x8xf32>
    %50 = arith.mulf %47, %49 : vector<4x8x8xf32>
    %51 = tpu.transpose %50, [1, 0, 2] : vector<4x8x8xf32> -> vector<8x4x8xf32>
    %52 = vector.shape_cast %51 : vector<8x4x8xf32> to vector<8x32xf32>
    %53 = vector.extract_strided_slice %12 {offsets = [8, 0], sizes = [8, 32], strides = [1, 1]} : vector<16x32xf32> to vector<8x32xf32>
    %54 = vector.shape_cast %53 : vector<8x32xf32> to vector<8x4x8xf32>
    %55 = tpu.transpose %54, [1, 0, 2] : vector<8x4x8xf32> -> vector<4x8x8xf32>
    %56 = arith.truncf %55 : vector<4x8x8xf32> to vector<4x8x8xbf16>
    %57 = vector.extract_strided_slice %13 {offsets = [8, 0], sizes = [8, 32], strides = [1, 1]} : vector<16x32xf32> to vector<8x32xf32>
    %58 = vector.shape_cast %57 : vector<8x32xf32> to vector<8x4x8xf32>
    %59 = tpu.transpose %58, [1, 0, 2] : vector<8x4x8xf32> -> vector<4x8x8xf32>
    %60 = arith.truncf %59 : vector<4x8x8xf32> to vector<4x8x8xbf16>
    %61 = vector.extract_strided_slice %14 {offsets = [8, 0], sizes = [8, 32], strides = [1, 1]} : vector<16x32xf32> to vector<8x32xf32>
    %62 = vector.shape_cast %61 : vector<8x32xf32> to vector<8x4x8xf32>
    %63 = tpu.transpose %62, [1, 0, 2] : vector<8x4x8xf32> -> vector<4x8x8xf32>
    %64 = arith.truncf %63 : vector<4x8x8xf32> to vector<4x8x8xbf16>
    "tpu.trace_start"() <{level = 10 : i32, message = "hqd,hkd->hqk"}> : () -> ()
    %cst_18 = arith.constant dense<0.000000e+00> : vector<4x8x8xf32>
    %65 = tpu.matmul %56, %60, %cst_18 {dimension_numbers = #tpu.dot_dimension_numbers<[2], [2], [1], [1], [0, 0, 0, 1, 1, 1], [0], [0]>} : vector<4x8x8xbf16>, vector<4x8x8xbf16>, vector<4x8x8xf32> -> vector<4x8x8xf32>
    "tpu.trace_stop"() : () -> ()
    %66 = vector.extract_strided_slice %20 {offsets = [1, 0, 0], sizes = [1, 1, 8], strides = [1, 1, 1]} : vector<2x1x8xf32> to vector<1x1x8xf32>
    %67 = vector.shape_cast %66 : vector<1x1x8xf32> to vector<1x8xf32>
    %68 = vector.shape_cast %67 : vector<1x8xf32> to vector<1x1x8xf32>
    %69 = vector.broadcast %68 : vector<1x1x8xf32> to vector<4x8x8xf32>
    %70 = arith.addf %65, %69 : vector<4x8x8xf32>
    %cst_19 = arith.constant dense<0xFF800000> : vector<4x8xf32>
    %71 = vector.multi_reduction <maximumf>, %70, %cst_19 [2] : vector<4x8x8xf32> to vector<4x8xf32>
    %72 = vector.shape_cast %71 : vector<4x8xf32> to vector<4x8x1xf32>
    %73 = vector.broadcast %72 : vector<4x8x1xf32> to vector<4x8x8xf32>
    %74 = arith.subf %70, %73 : vector<4x8x8xf32>
    %75 = math.exp %74 : vector<4x8x8xf32>
    %cst_20 = arith.constant dense<0.000000e+00> : vector<4x8xf32>
    %76 = vector.multi_reduction <add>, %75, %cst_20 [2] : vector<4x8x8xf32> to vector<4x8xf32>
    %77 = vector.shape_cast %76 : vector<4x8xf32> to vector<4x8x1xf32>
    %78 = arith.truncf %75 : vector<4x8x8xf32> to vector<4x8x8xbf16>
    "tpu.trace_start"() <{level = 10 : i32, message = "hqk,hkd->hqd"}> : () -> ()
    %cst_21 = arith.constant dense<0.000000e+00> : vector<4x8x8xf32>
    %79 = tpu.matmul %78, %64, %cst_21 {dimension_numbers = #tpu.dot_dimension_numbers<[2], [1], [1], [2], [0, 0, 0, 1, 1, 2], [0], [0]>} : vector<4x8x8xbf16>, vector<4x8x8xbf16>, vector<4x8x8xf32> -> vector<4x8x8xf32>
    "tpu.trace_stop"() : () -> ()
    %80 = tpu.reciprocal %77 {approx = true} : vector<4x8x1xf32> -> vector<4x8x1xf32>
    %81 = vector.broadcast %80 : vector<4x8x1xf32> to vector<4x8x8xf32>
    %82 = arith.mulf %79, %81 : vector<4x8x8xf32>
    %83 = tpu.transpose %82, [1, 0, 2] : vector<4x8x8xf32> -> vector<8x4x8xf32>
    %84 = vector.shape_cast %83 : vector<8x4x8xf32> to vector<8x32xf32>
    %85 = tpu.concatenate %52, %84 in 0 : vector<8x32xf32>, vector<8x32xf32> -> vector<16x32xf32>
    %c0_22 = arith.constant 0 : index
    %c0_23 = arith.constant 0 : index
    %c0_24 = arith.constant 0 : index
    %86 = vector.load %arg10[%c0_22, %c0_23, %c0_24] : memref<1x6x32xf32, #tpu.memory_space<vmem>>, vector<1x6x32xf32>
    %87 = vector.shape_cast %86 : vector<1x6x32xf32> to vector<6x32xf32>
    %88 = arith.truncf %85 : vector<16x32xf32> to vector<16x32xbf16>
    %c0_25 = arith.constant 0 : index
    %c0_26 = arith.constant 0 : index
    %c0_27 = arith.constant 0 : index
    %89 = vector.load %arg6[%c0_25, %c0_26, %c0_27] : memref<1x32x32xbf16, #tpu.memory_space<vmem>>, vector<1x32x32xbf16>
    %90 = vector.shape_cast %89 : vector<1x32x32xbf16> to vector<32x32xbf16>
    %cst_28 = arith.constant dense<0.000000e+00> : vector<16x32xf32>
    %91 = tpu.matmul %88, %90, %cst_28 {dimension_numbers = #tpu.dot_dimension_numbers<[1], [0], [0], [1], [0, 0, 1, 1], [], []>} : vector<16x32xbf16>, vector<32x32xbf16>, vector<16x32xf32> -> vector<16x32xf32>
    %92 = vector.extract_strided_slice %87 {offsets = [0, 0], sizes = [1, 32], strides = [1, 1]} : vector<6x32xf32> to vector<1x32xf32>
    %93 = vector.broadcast %92 : vector<1x32xf32> to vector<16x32xf32>
    %94 = arith.addf %91, %93 : vector<16x32xf32>
    %95 = arith.addf %94, %3 : vector<16x32xf32>
    %96 = vector.extract_strided_slice %87 {offsets = [1, 0], sizes = [1, 32], strides = [1, 1]} : vector<6x32xf32> to vector<1x32xf32>
    %97 = vector.extract_strided_slice %87 {offsets = [2, 0], sizes = [1, 32], strides = [1, 1]} : vector<6x32xf32> to vector<1x32xf32>
    %cst_29 = arith.constant dense<0.000000e+00> : vector<16xf32>
    %98 = vector.multi_reduction <add>, %95, %cst_29 [1] : vector<16x32xf32> to vector<16xf32>
    %99 = vector.shape_cast %98 : vector<16xf32> to vector<16x1xf32>
    %cst_30 = arith.constant 3.200000e+01 : f32
    %100 = vector.broadcast %cst_30 : f32 to vector<16x1xf32>
    %101 = arith.divf %99, %100 : vector<16x1xf32>
    %102 = vector.broadcast %101 : vector<16x1xf32> to vector<16x32xf32>
    %103 = arith.subf %95, %102 : vector<16x32xf32>
    %104 = arith.mulf %103, %103 : vector<16x32xf32>
    %cst_31 = arith.constant dense<0.000000e+00> : vector<16xf32>
    %105 = vector.multi_reduction <add>, %104, %cst_31 [1] : vector<16x32xf32> to vector<16xf32>
    %106 = vector.shape_cast %105 : vector<16xf32> to vector<16x1xf32>
    %cst_32 = arith.constant 3.200000e+01 : f32
    %107 = vector.broadcast %cst_32 : f32 to vector<16x1xf32>
    %108 = arith.divf %106, %107 : vector<16x1xf32>
    %109 = vector.broadcast %101 : vector<16x1xf32> to vector<16x32xf32>
    %110 = arith.subf %95, %109 : vector<16x32xf32>
    %cst_33 = arith.constant 9.99999996E-13 : f32
    %111 = vector.broadcast %cst_33 : f32 to vector<16x1xf32>
    %112 = arith.addf %108, %111 : vector<16x1xf32>
    %113 = math.rsqrt %112 : vector<16x1xf32>
    %114 = vector.broadcast %113 : vector<16x1xf32> to vector<16x32xf32>
    %115 = arith.mulf %110, %114 : vector<16x32xf32>
    %116 = vector.broadcast %96 : vector<1x32xf32> to vector<16x32xf32>
    %117 = arith.mulf %115, %116 : vector<16x32xf32>
    %118 = vector.broadcast %97 : vector<1x32xf32> to vector<16x32xf32>
    %119 = arith.addf %117, %118 : vector<16x32xf32>
    %120 = arith.truncf %119 : vector<16x32xf32> to vector<16x32xbf16>
    %c0_34 = arith.constant 0 : index
    %c0_35 = arith.constant 0 : index
    %c0_36 = arith.constant 0 : index
    %121 = vector.load %arg7[%c0_34, %c0_35, %c0_36] : memref<1x32x64xbf16, #tpu.memory_space<vmem>>, vector<1x32x64xbf16>
    %122 = vector.shape_cast %121 : vector<1x32x64xbf16> to vector<32x64xbf16>
    %cst_37 = arith.constant dense<0.000000e+00> : vector<16x64xf32>
    %123 = tpu.matmul %120, %122, %cst_37 {dimension_numbers = #tpu.dot_dimension_numbers<[1], [0], [0], [1], [0, 0, 1, 1], [], []>} : vector<16x32xbf16>, vector<32x64xbf16>, vector<16x64xf32> -> vector<16x64xf32>
    %c0_38 = arith.constant 0 : index
    %c0_39 = arith.constant 0 : index
    %c0_40 = arith.constant 0 : index
    %124 = vector.load %arg8[%c0_38, %c0_39, %c0_40] : memref<1x1x64xf32, #tpu.memory_space<vmem>>, vector<1x1x64xf32>
    %125 = vector.shape_cast %124 : vector<1x1x64xf32> to vector<1x64xf32>
    %126 = vector.broadcast %125 : vector<1x64xf32> to vector<16x64xf32>
    %127 = arith.addf %123, %126 : vector<16x64xf32>
    %cst_41 = arith.constant 5.000000e-01 : f32
    %128 = vector.broadcast %cst_41 : f32 to vector<16x64xf32>
    %129 = arith.mulf %128, %127 : vector<16x64xf32>
    %cst_42 = arith.constant 4.471500e-02 : f32
    %130 = vector.broadcast %cst_42 : f32 to vector<16x64xf32>
    %131 = arith.mulf %130, %127 : vector<16x64xf32>
    %132 = arith.mulf %131, %127 : vector<16x64xf32>
    %133 = arith.mulf %132, %127 : vector<16x64xf32>
    %134 = arith.addf %127, %133 : vector<16x64xf32>
    %cst_43 = arith.constant 0.797884583 : f32
    %135 = vector.broadcast %cst_43 : f32 to vector<16x64xf32>
    %136 = arith.mulf %135, %134 : vector<16x64xf32>
    %137 = math.tanh %136 : vector<16x64xf32>
    %cst_44 = arith.constant 1.000000e+00 : f32
    %138 = vector.broadcast %cst_44 : f32 to vector<16x64xf32>
    %139 = arith.addf %138, %137 : vector<16x64xf32>
    %140 = arith.mulf %129, %139 : vector<16x64xf32>
    %141 = arith.truncf %140 : vector<16x64xf32> to vector<16x64xbf16>
    %c0_45 = arith.constant 0 : index
    %c0_46 = arith.constant 0 : index
    %c0_47 = arith.constant 0 : index
    %142 = vector.load %arg9[%c0_45, %c0_46, %c0_47] : memref<1x64x32xbf16, #tpu.memory_space<vmem>>, vector<1x64x32xbf16>
    %143 = vector.shape_cast %142 : vector<1x64x32xbf16> to vector<64x32xbf16>
    %cst_48 = arith.constant dense<0.000000e+00> : vector<16x32xf32>
    %144 = tpu.matmul %141, %143, %cst_48 {dimension_numbers = #tpu.dot_dimension_numbers<[1], [0], [0], [1], [0, 0, 1, 1], [], []>} : vector<16x64xbf16>, vector<64x32xbf16>, vector<16x32xf32> -> vector<16x32xf32>
    %145 = vector.extract_strided_slice %87 {offsets = [3, 0], sizes = [1, 32], strides = [1, 1]} : vector<6x32xf32> to vector<1x32xf32>
    %146 = vector.broadcast %145 : vector<1x32xf32> to vector<16x32xf32>
    %147 = arith.addf %144, %146 : vector<16x32xf32>
    %148 = arith.addf %147, %119 : vector<16x32xf32>
    %149 = vector.extract_strided_slice %87 {offsets = [4, 0], sizes = [1, 32], strides = [1, 1]} : vector<6x32xf32> to vector<1x32xf32>
    %150 = vector.extract_strided_slice %87 {offsets = [5, 0], sizes = [1, 32], strides = [1, 1]} : vector<6x32xf32> to vector<1x32xf32>
    %cst_49 = arith.constant dense<0.000000e+00> : vector<16xf32>
    %151 = vector.multi_reduction <add>, %148, %cst_49 [1] : vector<16x32xf32> to vector<16xf32>
    %152 = vector.shape_cast %151 : vector<16xf32> to vector<16x1xf32>
    %cst_50 = arith.constant 3.200000e+01 : f32
    %153 = vector.broadcast %cst_50 : f32 to vector<16x1xf32>
    %154 = arith.divf %152, %153 : vector<16x1xf32>
    %155 = vector.broadcast %154 : vector<16x1xf32> to vector<16x32xf32>
    %156 = arith.subf %148, %155 : vector<16x32xf32>
    %157 = arith.mulf %156, %156 : vector<16x32xf32>
    %cst_51 = arith.constant dense<0.000000e+00> : vector<16xf32>
    %158 = vector.multi_reduction <add>, %157, %cst_51 [1] : vector<16x32xf32> to vector<16xf32>
    %159 = vector.shape_cast %158 : vector<16xf32> to vector<16x1xf32>
    %cst_52 = arith.constant 3.200000e+01 : f32
    %160 = vector.broadcast %cst_52 : f32 to vector<16x1xf32>
    %161 = arith.divf %159, %160 : vector<16x1xf32>
    %162 = vector.broadcast %154 : vector<16x1xf32> to vector<16x32xf32>
    %163 = arith.subf %148, %162 : vector<16x32xf32>
    %cst_53 = arith.constant 9.99999996E-13 : f32
    %164 = vector.broadcast %cst_53 : f32 to vector<16x1xf32>
    %165 = arith.addf %161, %164 : vector<16x1xf32>
    %166 = math.rsqrt %165 : vector<16x1xf32>
    %167 = vector.broadcast %166 : vector<16x1xf32> to vector<16x32xf32>
    %168 = arith.mulf %163, %167 : vector<16x32xf32>
    %169 = vector.broadcast %149 : vector<1x32xf32> to vector<16x32xf32>
    %170 = arith.mulf %168, %169 : vector<16x32xf32>
    %171 = vector.broadcast %150 : vector<1x32xf32> to vector<16x32xf32>
    %172 = arith.addf %170, %171 : vector<16x32xf32>
    %c0_54 = arith.constant 0 : index
    %c0_55 = arith.constant 0 : index
    %173 = vector.load %arg12[%c0_54, %c0_55] : memref<16x32xf32, #tpu.memory_space<vmem>>, vector<16x32xf32>
    tpu.vector_store %arg12[%c0_54, %c0_55], %172 {strides = array<i32>} : memref<16x32xf32, #tpu.memory_space<vmem>>, vector<16x32xf32>,
    %c1_i32 = arith.constant 1 : i32
    %174 = arith.cmpi eq, %arg1, %c1_i32 : i32
    %175 = arith.extui %174 : i1 to i32
    %c0_i32_56 = arith.constant 0 : i32
    %176 = arith.cmpi ne, %175, %c0_i32_56 : i32
    scf.if %176 {
      %177 = vector.shape_cast %172 : vector<16x32xf32> to vector<2x8x32xf32>
      %c0_57 = arith.constant 0 : index
      %c0_58 = arith.constant 0 : index
      %c0_59 = arith.constant 0 : index
      %178 = vector.load %arg11[%c0_57, %c0_58, %c0_59] : memref<2x8x32xf32, #tpu.memory_space<vmem>>, vector<2x8x32xf32>
      tpu.vector_store %arg11[%c0_57, %c0_58, %c0_59], %177 {strides = array<i32>} : memref<2x8x32xf32, #tpu.memory_space<vmem>>, vector<2x8x32xf32>,
    } else {
    }
    return
  }
  func.func @transform_0(%arg0: i32, %arg1: i32) -> (i32, i32, i32) {
    %c0_i32 = arith.constant 0 : i32
    %c0_i32_0 = arith.constant 0 : i32
    %c0_i32_1 = arith.constant 0 : i32
    return %arg0, %c0_i32, %c0_i32_0 : i32, i32, i32
  }
  func.func @transform_1(%arg0: i32, %arg1: i32) -> (i32, i32, i32) {
    %c0_i32 = arith.constant 0 : i32
    %c0_i32_0 = arith.constant 0 : i32
    %c0_i32_1 = arith.constant 0 : i32
    return %arg0, %c0_i32, %c0_i32_0 : i32, i32, i32
  }
  func.func @transform_2(%arg0: i32, %arg1: i32) -> (i32, i32, i32) {
    %c0_i32 = arith.constant 0 : i32
    %c0_i32_0 = arith.constant 0 : i32
    %c0_i32_1 = arith.constant 0 : i32
    return %arg1, %c0_i32, %c0_i32_0 : i32, i32, i32
  }
  func.func @transform_3(%arg0: i32, %arg1: i32) -> (i32, i32, i32) {
    %c0_i32 = arith.constant 0 : i32
    %c0_i32_0 = arith.constant 0 : i32
    %c0_i32_1 = arith.constant 0 : i32
    return %arg1, %c0_i32, %c0_i32_0 : i32, i32, i32
  }
  func.func @transform_4(%arg0: i32, %arg1: i32) -> (i32, i32, i32) {
    %c0_i32 = arith.constant 0 : i32
    %c0_i32_0 = arith.constant 0 : i32
    %c0_i32_1 = arith.constant 0 : i32
    return %arg1, %c0_i32, %c0_i32_0 : i32, i32, i32
  }
  func.func @transform_5(%arg0: i32, %arg1: i32) -> (i32, i32, i32) {
    %c0_i32 = arith.constant 0 : i32
    %c0_i32_0 = arith.constant 0 : i32
    %c0_i32_1 = arith.constant 0 : i32
    return %arg1, %c0_i32, %c0_i32_0 : i32, i32, i32
  }
  func.func @transform_6(%arg0: i32, %arg1: i32) -> (i32, i32, i32) {
    %c0_i32 = arith.constant 0 : i32
    %c0_i32_0 = arith.constant 0 : i32
    %c0_i32_1 = arith.constant 0 : i32
    return %arg1, %c0_i32, %c0_i32_0 : i32, i32, i32
  }
  func.func @transform_7(%arg0: i32, %arg1: i32) -> (i32, i32, i32) {
    %c0_i32 = arith.constant 0 : i32
    %c0_i32_0 = arith.constant 0 : i32
    %c0_i32_1 = arith.constant 0 : i32
    return %arg1, %c0_i32, %c0_i32_0 : i32, i32, i32
  }
  func.func @transform_8(%arg0: i32, %arg1: i32) -> (i32, i32, i32) {
    %c0_i32 = arith.constant 0 : i32
    %c0_i32_0 = arith.constant 0 : i32
    %c0_i32_1 = arith.constant 0 : i32
    return %arg1, %c0_i32, %c0_i32_0 : i32, i32, i32
  }
  func.func @transform_9(%arg0: i32, %arg1: i32) -> (i32, i32, i32) {
    %c0_i32 = arith.constant 0 : i32
    %c0_i32_0 = arith.constant 0 : i32
    %c0_i32_1 = arith.constant 0 : i32
    return %arg0, %c0_i32, %c0_i32_0 : i32, i32, i32
  }
}

</mosaic_0001>

<bundles_post_ra>
// kernel: tpu_custom_call.1
= control target key start
LH: loop header
LB: loop body
LE: loop exit
PB: predicated region body
PF: predicated region fallthrough
CT: control target
= control target key end

     0   :  { %14 = vsyncpa [#allocation4], 0  ;;  %s3590_s30 = smov 0   ;;  %s3592_s10 = smov 0   ;;  %s4152_s0 = inlined_call_operand.vmem [shape: f32[2,8,32], index: 0, kind: input, shape index: {}]   ;;  %s4153_s1 = inlined_call_operand.vmem [shape: f32[2,1,8], index: 1, kind: input, shape index: {}]   ;;  %s4154_s2 = inlined_call_operand.vmem [shape: bf16[2,32,96], index: 2, kind: input, shape index: {}]   ;;  %s4155_s3 = inlined_call_operand.vmem [shape: f32[2,1,96], index: 3, kind: input, shape index: {}]   ;;  %s4156_s4 = inlined_call_operand.vmem [shape: bf16[2,32,32], index: 4, kind: input, shape index: {}]   ;;  %s4157_s5 = inlined_call_operand.vmem [shape: bf16[2,32,64], index: 5, kind: input, shape index: {}]   ;;  %s4158_s6 = inlined_call_operand.vmem [shape: f32[2,1,64], index: 6, kind: input, shape index: {}]   ;;  %s4159_s7 = inlined_call_operand.vmem [shape: bf16[2,64,32], index: 7, kind: input, shape index: {}]   ;;  %s4160_s8 = inlined_call_operand.vmem [shape: f32[2,6,32], index: 8, kind: input, shape index: {}]   ;;  %s4161_s9 = inlined_call_operand.hbm [shape: f32[2,8,32], index: 9, kind: output, shape index: {}]  }
   0x1   :  { %s3594_s11 = smov 0  }
   0x2 LB: > { %s29_s13 = sadd.s32 1, %s3520_s10  ;;  %p3111_p1 = scmp.ge.s32.totalorder %s3524_s11, 1  ;;  %s3524_s11 = sphi %s3594_s11, %s20_s11   ;;  %s3520_s10 = sphi %s3592_s10, %s4168_s10   ;;  %s3516_s30 = sphi %s3590_s30, %s4167_s30  }
   0x3   : > { %p30_p0 = scmp.ge.s32.totalorder %s29_s13, 2  ;;  %p376_p2 = scmp.lt.s32.totalorder %s3524_s11, 3 }
   0x5   : > { %s4170_s13 = smov (%p30_p0, %s29_s13), 0  ;;  %p377_p3 = pnand %p3111_p1, %p376_p2 }
   0x6   : > { %4162 = sst [smem:[#allocation6_spill]] %s4170_s13  ;;  %p452_p4 = scmp.lt.s32.totalorder (!%p377_p3), %s3516_s30, 1 }
   0x7   : > { %380 = sbr.rel (%p377_p3) target bundleno = 3026 (0xbd2), region = 56  ;;  %p3121_p5 = scmp.ne.s32.totalorder (!%p377_p3), %s3516_s30, 0 }
   0xe   : > { %s3613_s14 = scalar_select %p452_p4, %s3516_s30, 1 }
   0xf   : > { %487 = sbr.rel (%p3121_p5) target bundleno = 22 (0x16), region = 60  ;;  %v488_v0 = vld [vmem:[%s4152_s0] sm:$0xff] (!%p3121_p5)  ;;  %vm490_vm0 = vcmask (!%p3121_p5), 261120   ;;  %v489_v1 = vld [vmem:[%s4152_s0 + $0x8] sm:$0xff] (!%p3121_p5) }
  0x10   : > { %s3175_s15 = sshll.u32 %s3613_s14, 4  ;;  %s472_s12 = scalar_lea.vmem %s4158_s6, %s3613_s14  ;;  %491 = vst.msk [vmem:[#allocation2] sm:$0xff] (!%p3121_p5), %vm490_vm0, %v488_v0  ;;  %492 = vst.msk [vmem:[#allocation2 + $0x8] sm:$0xff] (!%p3121_p5), %vm490_vm0, %v489_v1 }
  0x11   : > { %s456_s21 = scalar_lea.vmem %s4154_s2, %s3175_s15  ;;  %s3626_s24 = scalar_lea.vmem %s4156_s4, %s3175_s15 }
  0x12   : > { %s3631_s27 = scalar_lea.vmem %s4157_s5, %s3175_s15  ;;  %s3178_s16 = sshll.u32 %s3613_s14, 5 }
  0x13   : > { %s3120_s17 = sshll.u32 %s3613_s14, 3  ;;  %s3642_s19 = scalar_lea.vmem %s4159_s7, %s3178_s16 }
  0x14   : > { %s3647_s23 = scalar_lea.vmem %s4160_s8, %s3120_s17 }
  0x16 PF: > { %v3416_v2 = vld [vmem:[%s456_s21] sm:$0xff]   ;;  %v3526_v3 = vmov 0.0   ;;  %v3417_v4 = vld [vmem:[%s456_s21 + $0x8] sm:$0xff]   ;;  %vm3527_vm1 = vmmov 0   ;;  %vm519_vm2 = vcmask 261120   ;;  %s4163_s21 = scalar_lea.vmem %s4155_s3, %s3613_s14  ;;  %s3528_s29 = smov 104   ;;  %v585_v17 = vlaneseq }
  0x17   : > { %3225 = vmatprep.subr.bf16.mxu0 %v3526_v3  ;;  %3233 = vmatprep.subr.bf16.mxu1 %v3526_v3  ;;  %v493_v5 = vld [vmem:[#allocation2] sm:$0xff]  ;;  %v494_v6 = vld [vmem:[#allocation2 + $0x8] sm:$0xff]  ;;  %s3529_s16 = smov 120   ;;  %s3530_s17 = smov 96   ;;  %v3532_v15 = vmov 1983009808  }
  0x18   : > { %3226 = vmatpush3.bf16.msra.mxu0 %v3416_v2  ;;  %3229 = vmatprep.mubr.msk.bf16.mxu0 %vm3527_vm1, %v3526_v3  ;;  %v495_v7 = vpack.c.bf16 %v494_v6, %v493_v5  ;;  %v3122_v8 = vld [vmem:[%s4163_s21] ss:$0 sm:$0xff]  ;;  %s3531_s20 = smov 112   ;;  %v583_v16 = vunpack.c.l.s4 %v3532_v15  ;;  %v3533_v18 = vmov 1934713408   ;;  %v3677_v21 = vshrl.u32 %v585_v17, 7 }
  0x19   : > { %3227 = vmatprep.subr.bf16.mxu0 %v3526_v3  ;;  %3235 = vmatprep.mubr.msk.bf16.mxu1 %vm3527_vm1, %v3526_v3  ;;  %v615_v19 = vunpack.c.l.s4 %v3533_v18  ;;  %s3534_s22 = smov 64   ;;  %vm1030_vm3 = vcmask 64512   ;;  %vm1258_vm4 = vcmask 1043456   ;;  %s3536_s13 = smov 8   ;;  %vm1597_vm7 = vcmask 130048  }
  0x1a   : > { %v584_v20 = vunpack.c.0.s8 %v583_v16  ;;  %s3537_s18 = smov 24   ;;  %vm1599_vm8 = vcmask 195584   ;;  %vm2858_vm9 = vcmask 523264   ;;  %p3170_p6 = scmp.ne.s32.totalorder %s3516_s30, 1 }
  0x1b   : > { %v616_v26 = vunpack.c.0.s8 %v615_v19 }
  0x1c   : > { %3228 = vmatpush3.bf16.msra.mxu0 %v3417_v4  ;;  %v3681_v27 = vsub.s32 %v584_v20, %v3677_v21 }
  0x1d   : > { %3239 = vmatprep.subr.bf16.mxu0 %v3526_v3  ;;  %v3686_v31 = vsub.s32 %v616_v26, %v3677_v21 }
  0x1f   : > { %3230 = vmatmul.mubr.msk.bf16.vlgmr.msra.gmra.mrb[0].mxu0 %vm519_vm2, %v495_v7 }
  0x20   : > { %3241 = vmatprep.mubr.msk.bf16.mxu0 %vm3527_vm1, %v3526_v3 }
  0xf2   : > { %v557_v9 = vpop.f32.mrb[0].mxu0 }
  0xf3   : > { %v558_v10 = vadd.f32 %v3122_v8, %v557_v9  ;;  %v3231_v11 = vpop.f32.mrb[1].mxu0 }
  0xf4   : > { %v560_v12 = vpop.f32.mrb[2].mxu0 }
  0xf5   : > { %v3672_v13 = vadd.f32 %v3122_v8, %v560_v12  ;;  %577 = vrot.lane.b32.xlu1 %v558_v10, %s3528_s29  ;;  %571 = vrot.lane.b32.xlu0 %v558_v10, %s3529_s16  ;;  %v3232_v14 = vpop.f32.mrb[3].mxu0 }
  0xf9   : > { %720 = vrot.lane.b32.xlu1 %v558_v10, %s3530_s17  ;;  %574 = vrot.lane.b32.xlu0 %v558_v10, %s3531_s20 }
 0x167   : > { %v578_v22 = vpop.permute.xlu1 %577  ;;  %v572_v23 = vpop.permute.xlu0 %571 }
 0x168   : > { %v596_v24 = vcombine.low %v572_v23, %v578_v22  ;;  %v597_v25 = vcombine.high %v572_v23, %v578_v22  ;;  %722 = vrot.lane.b32.xlu0 %v572_v23, %s3530_s17 }
 0x16a   : > { %v604_v32 = vrot.slane %v596_v24, %v3681_v27  ;;  %v611_v33 = vrot.slane %v597_v25, %v3681_v27 }
 0x16b   : > { %v575_v28 = vpop.permute.xlu0 %574  ;;  %v721_v0 = vpop.permute.xlu1 %720 }
 0x16c   : > { %v580_v29 = vcombine.low %v558_v10, %v575_v28  ;;  %v581_v30 = vcombine.high %v558_v10, %v575_v28  ;;  %726 = vrot.lane.b32.xlu0 %v578_v22, %s3530_s17  ;;  %724 = vrot.lane.b32.xlu1 %v575_v28, %s3530_s17 }
 0x16e   : > { %v588_v34 = vrot.slane %v580_v29, %v3681_v27  ;;  %v595_v35 = vrot.slane %v581_v30, %v3681_v27 }
 0x170   : > { %v612_v36 = vcombine.low %v588_v34, %v604_v32  ;;  %v613_v37 = vcombine.high %v588_v34, %v604_v32  ;;  %v628_v38 = vcombine.low %v595_v35, %v611_v33  ;;  %v629_v39 = vcombine.high %v595_v35, %v611_v33  ;;  %1605 = vrot.lane.b32.xlu0 %v3672_v13, %s3531_s20 }
 0x171   : > { %1602 = vrot.lane.b32.xlu1 %v3672_v13, %s3529_s16 }
 0x172   : > { %v620_v40 = vrot.slane %v612_v36, %v3686_v31  ;;  %v627_v41 = vrot.slane %v613_v37, %v3686_v31  ;;  %v636_v42 = vrot.slane %v628_v38, %v3686_v31  ;;  %v643_v43 = vrot.slane %v629_v39, %v3686_v31 }
 0x174   : > { %v648_v44 = vcombine.low %v620_v40, %v627_v41  ;;  %v3126_v45 = vcombine.high %v620_v40, %v627_v41  ;;  %v664_v46 = vcombine.low %v636_v42, %v643_v43  ;;  %v3127_v47 = vcombine.high %v636_v42, %v643_v43  ;;  %872 = vrot.lane.b32.xlu0 %v558_v10, %s3534_s22 }
 0x175   : > { %1608 = vrot.lane.b32.xlu1 %v3672_v13, %s3528_s29 }
 0x176   : > { %v655_v48 = vrot.slane %v648_v44, %v3681_v27  ;;  %v663_v49 = vrot.slane %v3126_v45, %v3681_v27  ;;  %v671_v50 = vrot.slane %v664_v46, %v3681_v27  ;;  %v679_v51 = vrot.slane %v3127_v47, %v3681_v27 }
 0x178   : > { %1751 = vrot.lane.b32.xlu0 %v3672_v13, %s3530_s17  ;;  %v680_v52 = vcombine.low %v655_v48, %v663_v49  ;;  %v681_v53 = vcombine.high %v655_v48, %v663_v49  ;;  %v696_v54 = vcombine.low %v671_v50, %v679_v51  ;;  %v697_v55 = vcombine.high %v671_v50, %v679_v51 }
 0x179   : > { %874 = vrot.lane.b32.xlu1 %v572_v23, %s3534_s22 }
 0x17a   : > { %v688_v56 = vrot.slane %v680_v52, %v3686_v31  ;;  %v704_v57 = vrot.slane %v696_v54, %v3686_v31  ;;  %v695_v58 = vrot.slane %v681_v53, %v3686_v31  ;;  %v711_v59 = vrot.slane %v697_v55, %v3686_v31 }
 0x17c   : > { %876 = vrot.lane.b32.xlu0 %v575_v28, %s3534_s22  ;;  %v3714_v60 = vcombine.low %v688_v56, %v704_v57  ;;  %v3716_v61 = vcombine.high %v688_v56, %v704_v57  ;;  %v3718_v62 = vcombine.low %v695_v58, %v711_v59  ;;  %v3720_v63 = vcombine.high %v695_v58, %v711_v59 }
 0x17d   : > { %878 = vrot.lane.b32.xlu1 %v578_v22, %s3534_s22 }
 0x1da   : > { %v723_v1 = vpop.permute.xlu0 %722 }
 0x1de   : > { %v725_v2 = vpop.permute.xlu1 %724  ;;  %v727_v4 = vpop.permute.xlu0 %726 }
 0x1df   : > { %v732_v5 = vcombine.low %v721_v0, %v725_v2  ;;  %v733_v6 = vcombine.high %v721_v0, %v725_v2  ;;  %v748_v7 = vcombine.low %v723_v1, %v727_v4  ;;  %v749_v8 = vcombine.high %v723_v1, %v727_v4 }
 0x1e1   : > { %v740_v9 = vrot.slane %v732_v5, %v3681_v27  ;;  %v747_v10 = vrot.slane %v733_v6, %v3681_v27  ;;  %v756_v11 = vrot.slane %v748_v7, %v3681_v27  ;;  %v763_v12 = vrot.slane %v749_v8, %v3681_v27 }
 0x1e2   : > { %v3727_v14 = vpop.permute.xlu0 %1605 }
 0x1e3   : > { %v764_v15 = vcombine.low %v740_v9, %v756_v11  ;;  %v765_v16 = vcombine.high %v740_v9, %v756_v11  ;;  %v780_v17 = vcombine.low %v747_v10, %v763_v12  ;;  %v781_v18 = vcombine.high %v747_v10, %v763_v12  ;;  %v3729_v19 = vpop.permute.xlu1 %1602 }
 0x1e4   : > { %1753 = vrot.lane.b32.xlu1 %v3729_v19, %s3530_s17 }
 0x1e5   : > { %v772_v20 = vrot.slane %v764_v15, %v3686_v31  ;;  %v779_v22 = vrot.slane %v765_v16, %v3686_v31  ;;  %v788_v23 = vrot.slane %v780_v17, %v3686_v31  ;;  %v795_v24 = vrot.slane %v781_v18, %v3686_v31 }
 0x1e6   : > { %v873_v25 = vpop.permute.xlu0 %872 }
 0x1e7   : > { %v800_v26 = vcombine.low %v772_v20, %v779_v22  ;;  %v3128_v28 = vcombine.high %v772_v20, %v779_v22  ;;  %v816_v29 = vcombine.low %v788_v23, %v795_v24  ;;  %v3129_v30 = vcombine.high %v788_v23, %v795_v24  ;;  %v3737_v32 = vpop.permute.xlu1 %1608 }
 0x1e9   : > { %v807_v33 = vrot.slane %v800_v26, %v3681_v27  ;;  %v815_v34 = vrot.slane %v3128_v28, %v3681_v27  ;;  %v823_v35 = vrot.slane %v816_v29, %v3681_v27  ;;  %v831_v36 = vrot.slane %v3129_v30, %v3681_v27 }
 0x1ea   : > { %v3743_v37 = vpop.permute.xlu0 %1751  ;;  %v716_v29 = vpack.c.bf16 %v3714_v60, %v3714_v60  ;;  %v717_v30 = vpack.c.bf16 %v3716_v61, %v3716_v61 }
 0x1eb   : > { %v875_v38 = vpop.permute.xlu1 %874  ;;  %v832_v39 = vcombine.low %v807_v33, %v815_v34  ;;  %v848_v40 = vcombine.low %v823_v35, %v831_v36  ;;  %v833_v44 = vcombine.high %v807_v33, %v815_v34  ;;  %v849_v45 = vcombine.high %v823_v35, %v831_v36 }
 0x1ed   : > { %v840_v41 = vrot.slane %v832_v39, %v3686_v31  ;;  %v856_v42 = vrot.slane %v848_v40, %v3686_v31  ;;  %v847_v55 = vrot.slane %v833_v44, %v3686_v31  ;;  %v863_v56 = vrot.slane %v849_v45, %v3686_v31 }
 0x1ee   : > { %v877_v43 = vpop.permute.xlu0 %876 }
 0x1ef   : > { %v884_v46 = vcombine.low %v873_v25, %v877_v43  ;;  %v885_v47 = vcombine.high %v873_v25, %v877_v43  ;;  %v879_v48 = vpop.permute.xlu1 %878  ;;  %v864_v49 = vcombine.low %v840_v41, %v856_v42  ;;  %v865_v50 = vcombine.high %v840_v41, %v856_v42 }
 0x1f0   : > { %v900_v53 = vcombine.low %v875_v38, %v879_v48  ;;  %v901_v54 = vcombine.high %v875_v38, %v879_v48  ;;  %v866_v8 = vcombine.low %v847_v55, %v863_v56  ;;  %v867_v9 = vcombine.high %v847_v55, %v863_v56 }
 0x1f1   : > { %v892_v51 = vrot.slane %v884_v46, %v3681_v27  ;;  %v899_v52 = vrot.slane %v885_v47, %v3681_v27  ;;  %v868_v59 = vpack.c.bf16 %v864_v49, %v864_v49  ;;  %v869_v0 = vpack.c.bf16 %v865_v50, %v865_v50 }
 0x1f2   : > { %v908_v57 = vrot.slane %v900_v53, %v3681_v27  ;;  %v915_v58 = vrot.slane %v901_v54, %v3681_v27  ;;  %v870_v22 = vpack.c.bf16 %v866_v8, %v866_v8  ;;  %v871_v23 = vpack.c.bf16 %v867_v9, %v867_v9 }
 0x1f3   : > { %v1035_v6 = vsel %vm1030_vm3, %v868_v59, 0  ;;  %v1081_v7 = vsel %vm1030_vm3, %v869_v0, 0  ;;  %v718_v48 = vpack.c.bf16 %v3718_v62, %v3718_v62  ;;  %v719_v49 = vpack.c.bf16 %v3720_v63, %v3720_v63  ;;  %v564_v62 = vld [vmem:[%s4153_s1] sm:$0x1] }
 0x1f4   : > { %v916_v1 = vcombine.low %v892_v51, %v908_v57  ;;  %v917_v2 = vcombine.high %v892_v51, %v908_v57  ;;  %v932_v4 = vcombine.low %v899_v52, %v915_v58  ;;  %v933_v5 = vcombine.high %v899_v52, %v915_v58  ;;  %3234 = vmatpush3.bf16.xpose.msra.mxu1 %v1035_v6 }
 0x1f5   : > { %3240 = vmatpush3.bf16.xpose.msra.mxu0 %v1081_v7  ;;  %3245 = vmatprep.subr.bf16.mxu1 %v3526_v3  ;;  %v1127_v38 = vsel %vm1030_vm3, %v870_v22, 0  ;;  %v1173_v39 = vsel %vm1030_vm3, %v871_v23, 0  ;;  %vm566_vm5 = vcmp.eq.f32.partialorder %v564_v62, 0.0  ;;  %v3805_v63 = vsub.s32 0, %v3677_v21 }
 0x1f6   : > { %v924_v10 = vrot.slane %v916_v1, %v3686_v31  ;;  %v931_v11 = vrot.slane %v917_v2, %v3686_v31  ;;  %v940_v12 = vrot.slane %v932_v4, %v3686_v31  ;;  %v947_v15 = vrot.slane %v933_v5, %v3686_v31  ;;  %3251 = vmatprep.subr.bf16.mxu0 %v3526_v3 }
 0x1f7   : > { %v568_v52 = vsel %vm566_vm5, -1e+09, %v3526_v3 }
 0x1f8   : > { %v952_v16 = vcombine.low %v924_v10, %v931_v11  ;;  %v3130_v17 = vcombine.high %v924_v10, %v931_v11  ;;  %v968_v18 = vcombine.low %v940_v12, %v947_v15  ;;  %v3131_v20 = vcombine.high %v940_v12, %v947_v15 }
 0x1f9   : > { %v1028_v53 = vrot.slane %v568_v52, %v3805_v63 }
 0x1fa   : > { %v959_v24 = vrot.slane %v952_v16, %v3681_v27  ;;  %v967_v25 = vrot.slane %v3130_v17, %v3681_v27  ;;  %v975_v26 = vrot.slane %v968_v18, %v3681_v27  ;;  %v983_v28 = vrot.slane %v3131_v20, %v3681_v27 }
 0x1fb   : > { %3236 = vmatmul.mubr.msk.bf16.vlgmr.msra.gmra.mrb[0].mxu1 %vm1030_vm3, %v716_v29  ;;  %v1611_v29 = vcombine.low %v3672_v13, %v3727_v14 }
 0x1fc   : > { %v984_v33 = vcombine.low %v959_v24, %v967_v25  ;;  %v1000_v34 = vcombine.low %v975_v26, %v983_v28  ;;  %v985_v35 = vcombine.high %v959_v24, %v967_v25  ;;  %v1001_v36 = vcombine.high %v975_v26, %v983_v28  ;;  %3242 = vmatmul.mubr.msk.bf16.vlgmr.msra.gmra.mrb[4].mxu0 %vm1030_vm3, %v717_v30 }
 0x1fd   : > { %3246 = vmatpush3.bf16.xpose.msra.mxu1 %v1127_v38  ;;  %3252 = vmatpush3.bf16.xpose.msra.mxu0 %v1173_v39  ;;  %v1627_v24 = vcombine.low %v3729_v19, %v3737_v32  ;;  %v1628_v30 = vcombine.high %v3729_v19, %v3737_v32  ;;  %v1619_v39 = vrot.slane %v1611_v29, %v3681_v27 }
 0x1fe   : > { %v992_v40 = vrot.slane %v984_v33, %v3686_v31  ;;  %v1008_v60 = vrot.slane %v1000_v34, %v3686_v31  ;;  %v999_v41 = vrot.slane %v985_v35, %v3686_v31  ;;  %3247 = vmatprep.mubr.msk.bf16.mxu1 %vm3527_vm1, %v3526_v3  ;;  %v1015_v61 = vrot.slane %v1001_v36, %v3686_v31 }
 0x1ff   : > { %3253 = vmatprep.mubr.msk.bf16.mxu0 %vm3527_vm1, %v3526_v3  ;;  %3257 = vmatprep.subr.bf16.mxu1 %v3526_v3  ;;  %v1612_v35 = vcombine.high %v3672_v13, %v3727_v14  ;;  %v1635_v36 = vrot.slane %v1627_v24, %v3681_v27 }
 0x200   : > { %v1016_v42 = vcombine.low %v992_v40, %v1008_v60  ;;  %v1017_v43 = vcombine.high %v992_v40, %v1008_v60  ;;  %3263 = vmatprep.subr.bf16.mxu0 %v3526_v3  ;;  %v3783_v44 = vcombine.low %v999_v41, %v1015_v61  ;;  %v3785_v45 = vcombine.high %v999_v41, %v1015_v61 }
 0x201   : > { %v1642_v40 = vrot.slane %v1628_v30, %v3681_v27  ;;  %v1626_v60 = vrot.slane %v1612_v35, %v3681_v27  ;;  %v1643_v41 = vcombine.low %v1619_v39, %v1635_v36  ;;  %v1644_v61 = vcombine.high %v1619_v39, %v1635_v36 }
 0x202   : > { %v1020_v46 = vpack.c.bf16 %v1016_v42, %v1016_v42  ;;  %v1021_v47 = vpack.c.bf16 %v1017_v43, %v1017_v43 }
 0x204   : > { %v1260_v50 = vsel %vm1258_vm4, %v1020_v46, 0  ;;  %v1306_v51 = vsel %vm1258_vm4, %v1021_v47, 0  ;;  %3248 = vmatmul.mubr.msk.bf16.vlgmr.msra.gmra.mrb[4].mxu1 %vm1030_vm3, %v718_v48  ;;  %3254 = vmatmul.mubr.msk.bf16.vlgmr.msra.gmra.mrb[8].mxu0 %vm1030_vm3, %v719_v49  ;;  %v1659_v46 = vcombine.low %v1626_v60, %v1642_v40  ;;  %v1660_v48 = vcombine.high %v1626_v60, %v1642_v40 }
 0x205   : > { %3258 = vmatpush3.bf16.msra.mxu1 %v1260_v50  ;;  %3264 = vmatpush3.bf16.msra.mxu0 %v1306_v51  ;;  %v1651_v49 = vrot.slane %v1643_v41, %v3686_v31  ;;  %v1658_v50 = vrot.slane %v1644_v61, %v3686_v31 }
 0x206   : > { %3259 = vmatprep.mubr.msk.bf16.mxu1 %vm3527_vm1, %v3526_v3  ;;  %3265 = vmatprep.mubr.msk.bf16.mxu0 %vm3527_vm1, %v3526_v3 }
 0x207   : > { %3269 = vmatprep.subr.bf16.mxu1 %v3526_v3  ;;  %3275 = vmatprep.subr.bf16.mxu0 %v3526_v3 }
 0x256   : > { %v1754_v23 = vpop.permute.xlu1 %1753 }
 0x2ce   : > { %v1071_v54 = vpop.f32.mrb[0].mxu1 }
 0x2cf   : > { %v1072_v55 = vadd.f32 %v1071_v54, %v1028_v53  ;;  %v1117_v56 = vpop.f32.mrb[4].mxu0  ;;  %v3237_v57 = vpop.f32.mrb[1].mxu1 }
 0x2d0   : > { %v1118_v58 = vadd.f32 %v1117_v56, %v1028_v53  ;;  %v3243_v59 = vpop.f32.mrb[5].mxu0  ;;  %v1074_v0 = vpop.f32.mrb[2].mxu1  ;;  %v1667_v56 = vrot.slane %v1659_v46, %v3686_v31 }
 0x2d1   : > { %v1120_v1 = vpop.f32.mrb[6].mxu0  ;;  %v3238_v2 = vpop.f32.mrb[3].mxu1  ;;  %v1215_v4 = vsel %vm1030_vm3, %v1072_v55, -inf  ;;  %v1674_v0 = vrot.slane %v1660_v48, %v3686_v31 }
 0x2d2   : > { %v3244_v5 = vpop.f32.mrb[7].mxu0  ;;  %1216 = vmax.xlane.f32.xlu0 %v1215_v4  ;;  %v1218_v6 = vsel %vm1030_vm3, %v1118_v58, -inf }
 0x2d3   : > { %1219 = vmax.xlane.f32.xlu1 %v1218_v6 }
 0x2d7   : > { %v1163_v7 = vpop.f32.mrb[4].mxu1  ;;  %v1209_v9 = vpop.f32.mrb[8].mxu0 }
 0x2d8   : > { %v1164_v8 = vadd.f32 %v1163_v7, %v1028_v53  ;;  %v3249_v10 = vpop.f32.mrb[5].mxu1  ;;  %v1210_v11 = vadd.f32 %v1209_v9, %v1028_v53  ;;  %v3255_v12 = vpop.f32.mrb[9].mxu0  ;;  %v1679_v7 = vcombine.low %v1651_v49, %v1658_v50 }
 0x2d9   : > { %v1166_v15 = vpop.f32.mrb[6].mxu1  ;;  %v1212_v16 = vpop.f32.mrb[10].mxu0 }
 0x2da   : > { %v3250_v17 = vpop.f32.mrb[7].mxu1  ;;  %v1221_v18 = vsel %vm1030_vm3, %v1164_v8, -inf  ;;  %v3256_v20 = vpop.f32.mrb[11].mxu0  ;;  %v1224_v22 = vsel %vm1030_vm3, %v1210_v11, -inf  ;;  %v1695_v16 = vcombine.low %v1667_v56, %v1674_v0 }
 0x2db   : > { %1222 = vmax.xlane.f32.xlu0 %v1221_v18  ;;  %1225 = vmax.xlane.f32.xlu1 %v1224_v22  ;;  %v3143_v17 = vcombine.high %v1667_v56, %v1674_v0 }
 0x2dc   : > { %v1702_v35 = vrot.slane %v1695_v16, %v3681_v27 }
 0x2dd   : > { %v1710_v36 = vrot.slane %v3143_v17, %v3681_v27 }
 0x2ec   : > { %1757 = vrot.lane.b32.xlu1 %v3737_v32, %s3530_s17 }
 0x2f0   : > { %1905 = vrot.lane.b32.xlu1 %v3729_v19, %s3534_s22 }
 0x2f1   : > { %1755 = vrot.lane.b32.xlu0 %v3727_v14, %s3530_s17 }
 0x2f5   : > { %1903 = vrot.lane.b32.xlu0 %v3672_v13, %s3534_s22 }
 0x35f   : > { %v1217_v25 = vpop.xlane.xlu0 %1216 }
 0x360   : > { %v1227_v26 = vsub.f32 %v1072_v55, %v1217_v25  ;;  %v1220_v28 = vpop.xlane.xlu1 %1219  ;;  %v1022_v55 = vpack.c.bf16 %v3783_v44, %v3783_v44 }
 0x361   : > { %v1228_v33 = vsub.f32 %v1118_v58, %v1220_v28 }
 0x362   : > { %v1231_v34 = vmul.f32 1.442695, %v1227_v26  ;;  %v1352_v9 = vsel %vm1258_vm4, %v1022_v55, 0 }
 0x363   : > { %v1233_v38 = vmul.f32 1.442695, %v1228_v33  ;;  %v1686_v33 = vrot.slane %v1679_v7, %v3681_v27 }
 0x364   : > { %3426 = vpow2.f32 %v1231_v34 }
 0x365   : > { %3428 = vpow2.f32 %v1233_v38 }
 0x368   : > { %v1223_v42 = vpop.xlane.xlu0 %1222  ;;  %v1226_v43 = vpop.xlane.xlu1 %1225 }
 0x369   : > { %v1229_v19 = vsub.f32 %v1164_v8, %v1223_v42  ;;  %v1230_v47 = vsub.f32 %v1210_v11, %v1226_v43 }
 0x36b   : > { %v1235_v13 = vmul.f32 1.442695, %v1229_v19  ;;  %v1237_v51 = vmul.f32 1.442695, %v1230_v47 }
 0x36c   : > { %v1756_v62 = vpop.permute.xlu0 %1755  ;;  %v1758_v54 = vpop.permute.xlu1 %1757 }
 0x36d   : > { %3430 = vpow2.f32 %v1235_v13  ;;  %v1763_v52 = vcombine.low %v3743_v37, %v1756_v62  ;;  %v1764_v53 = vcombine.high %v3743_v37, %v1756_v62  ;;  %v1779_v57 = vcombine.low %v1754_v23, %v1758_v54 }
 0x36e   : > { %3432 = vpow2.f32 %v1237_v51  ;;  %v1780_v58 = vcombine.high %v1754_v23, %v1758_v54  ;;  %v3840_v59 = vpop.eup %3426  ;;  %v1023_v37 = vpack.c.bf16 %v3785_v45, %v3785_v45  ;;  %v3142_v45 = vcombine.high %v1651_v49, %v1658_v50 }
 0x36f   : > { %v1771_v1 = vrot.slane %v1763_v52, %v3681_v27  ;;  %v1778_v2 = vrot.slane %v1764_v53, %v3681_v27  ;;  %v3847_v4 = vpop.eup %3428  ;;  %v1787_v44 = vrot.slane %v1779_v57, %v3681_v27  ;;  %v1251_v6 = vpack.c.bf16 %v3840_v59, %v3840_v59 }
 0x370   : > { %v1794_v5 = vrot.slane %v1780_v58, %v3681_v27  ;;  %v1252_v8 = vpack.c.bf16 %v3847_v4, %v3847_v4  ;;  %v1398_v18 = vsel %vm1258_vm4, %v1023_v37, 0  ;;  %v1694_v34 = vrot.slane %v3142_v45, %v3681_v27 }
 0x371   : > { %v1795_v10 = vcombine.low %v1771_v1, %v1787_v44  ;;  %v1796_v11 = vcombine.high %v1771_v1, %v1787_v44  ;;  %3260 = vmatmul.mubr.msk.bf16.vlgmr.msra.gmra.mrb[8].mxu1 %vm1030_vm3, %v1251_v6  ;;  %v1727_v13 = vcombine.low %v1702_v35, %v1710_v36  ;;  %v1728_v6 = vcombine.high %v1702_v35, %v1710_v36 }
 0x372   : > { %v1811_v12 = vcombine.low %v1778_v2, %v1794_v5  ;;  %v1812_v15 = vcombine.high %v1778_v2, %v1794_v5  ;;  %3266 = vmatmul.mubr.msk.bf16.vlgmr.msra.gmra.mrb[12].mxu0 %vm1030_vm3, %v1252_v8  ;;  %3270 = vmatpush3.bf16.msra.mxu1 %v1352_v9  ;;  %v1711_v48 = vcombine.low %v1686_v33, %v1694_v34 }
 0x373   : > { %v1803_v20 = vrot.slane %v1795_v10, %v3686_v31  ;;  %v1810_v22 = vrot.slane %v1796_v11, %v3686_v31  ;;  %3276 = vmatpush3.bf16.msra.mxu0 %v1398_v18  ;;  %3271 = vmatprep.mubr.msk.bf16.mxu1 %vm3527_vm1, %v3526_v3  ;;  %v1735_v55 = vrot.slane %v1727_v13, %v3686_v31 }
 0x374   : > { %v1819_v23 = vrot.slane %v1811_v12, %v3686_v31  ;;  %v1826_v24 = vrot.slane %v1812_v15, %v3686_v31  ;;  %3277 = vmatprep.mubr.msk.bf16.mxu0 %vm3527_vm1, %v3526_v3  ;;  %3281 = vmatprep.subr.bf16.mxu1 %v3526_v3  ;;  %v1719_v54 = vrot.slane %v1711_v48, %v3686_v31 }
 0x375   : > { %v1831_v25 = vcombine.low %v1803_v20, %v1810_v22  ;;  %v3144_v26 = vcombine.high %v1803_v20, %v1810_v22  ;;  %3287 = vmatprep.subr.bf16.mxu0 %v3526_v3  ;;  %v1712_v5 = vcombine.high %v1686_v33, %v1694_v34  ;;  %v1742_v12 = vrot.slane %v1728_v6, %v3686_v31 }
 0x376   : > { %v1847_v28 = vcombine.low %v1819_v23, %v1826_v24  ;;  %v3145_v29 = vcombine.high %v1819_v23, %v1826_v24  ;;  %v1743_v37 = vcombine.low %v1719_v54, %v1735_v55  ;;  %v1744_v44 = vcombine.high %v1719_v54, %v1735_v55 }
 0x377   : > { %v3868_v30 = vpop.eup %3430  ;;  %v1838_v39 = vrot.slane %v1831_v25, %v3681_v27  ;;  %v1846_v40 = vrot.slane %v3144_v26, %v3681_v27  ;;  %v1726_v11 = vrot.slane %v1712_v5, %v3686_v31 }
 0x378   : > { %v3875_v38 = vpop.eup %3432  ;;  %v1854_v60 = vrot.slane %v1847_v28, %v3681_v27  ;;  %v1862_v41 = vrot.slane %v3145_v29, %v3681_v27  ;;  %v1253_v61 = vpack.c.bf16 %v3868_v30, %v3868_v30  ;;  %v1747_v9 = vpack.c.bf16 %v1743_v37, %v1743_v37 }
 0x379   : > { %v1254_v42 = vpack.c.bf16 %v3875_v38, %v3875_v38  ;;  %v1863_v19 = vcombine.low %v1838_v39, %v1846_v40  ;;  %v1864_v46 = vcombine.high %v1838_v39, %v1846_v40  ;;  %v1748_v10 = vpack.c.bf16 %v1744_v44, %v1744_v44 }
 0x37a   : > { %v1879_v43 = vcombine.low %v1854_v60, %v1862_v41  ;;  %v1880_v47 = vcombine.high %v1854_v60, %v1862_v41  ;;  %3272 = vmatmul.mubr.msk.bf16.vlgmr.msra.gmra.mrb[12].mxu1 %vm1030_vm3, %v1253_v61  ;;  %v1745_v16 = vcombine.low %v1726_v11, %v1742_v12  ;;  %v1746_v17 = vcombine.high %v1726_v11, %v1742_v12  ;;  %v1904_v11 = vpop.permute.xlu0 %1903  ;;  %v1906_v12 = vpop.permute.xlu1 %1905 }
 0x37b   : > { %3278 = vmatmul.mubr.msk.bf16.vlgmr.msra.gmra.mrb[16].mxu0 %vm1030_vm3, %v1254_v42  ;;  %v1871_v49 = vrot.slane %v1863_v19, %v3686_v31  ;;  %3283 = vmatprep.mubr.msk.bf16.mxu1 %vm3527_vm1, %v3526_v3  ;;  %v1878_v52 = vrot.slane %v1864_v46, %v3686_v31  ;;  %v565_v42 = vld [vmem:[%s4153_s1 + $0x1] sm:$0x1] }
 0x37c   : > { %v1887_v50 = vrot.slane %v1879_v43, %v3686_v31  ;;  %3289 = vmatprep.mubr.msk.bf16.mxu0 %vm3527_vm1, %v3526_v3  ;;  %v1894_v53 = vrot.slane %v1880_v47, %v3686_v31  ;;  %v1749_v18 = vpack.c.bf16 %v1745_v16, %v1745_v16  ;;  %v1750_v20 = vpack.c.bf16 %v1746_v17, %v1746_v17 }
 0x37d   : > { %vm567_vm6 = vcmp.eq.f32.partialorder %v565_v42, 0.0 }
 0x37e   : > { %v1895_v51 = vcombine.low %v1871_v49, %v1887_v50  ;;  %v1896_v62 = vcombine.high %v1871_v49, %v1887_v50  ;;  %v1897_v1 = vcombine.low %v1878_v52, %v1894_v53  ;;  %v1898_v2 = vcombine.high %v1878_v52, %v1894_v53 }
 0x37f   : > { %v569_v19 = vsel %vm567_vm6, -1e+09, %v3526_v3 }
 0x380   : > { %v1899_v56 = vpack.c.bf16 %v1895_v51, %v1895_v51  ;;  %v1900_v57 = vpack.c.bf16 %v1896_v62, %v1896_v62  ;;  %v1901_v7 = vpack.c.bf16 %v1897_v1, %v1897_v1  ;;  %v1902_v8 = vpack.c.bf16 %v1898_v2, %v1898_v2 }
 0x381   : > { %v2059_v43 = vrot.slane %v569_v19, %v3805_v63 }
 0x382   : > { %v2065_v58 = vsel %vm1030_vm3, %v1899_v56, 0  ;;  %v2111_v0 = vsel %vm1030_vm3, %v1900_v57, 0  ;;  %v2157_v15 = vsel %vm1030_vm3, %v1901_v7, 0  ;;  %v2203_v45 = vsel %vm1030_vm3, %v1902_v8, 0 }
 0x383   : > { %3282 = vmatpush3.bf16.xpose.msra.mxu1 %v2065_v58  ;;  %3288 = vmatpush3.bf16.xpose.msra.mxu0 %v2111_v0 }
 0x384   : > { %3293 = vmatprep.subr.bf16.mxu1 %v3526_v3  ;;  %3299 = vmatprep.subr.bf16.mxu0 %v3526_v3 }
 0x38a   : > { %3284 = vmatmul.mubr.msk.bf16.vlgmr.msra.gmra.mrb[16].mxu1 %vm1030_vm3, %v1747_v9  ;;  %3290 = vmatmul.mubr.msk.bf16.vlgmr.msra.gmra.mrb[20].mxu0 %vm1030_vm3, %v1748_v10  ;;  %v1239_v9 = vsel %vm1030_vm3, %v3840_v59, 0.0  ;;  %v1248_v10 = vsel %vm1030_vm3, %v3875_v38, 0.0 }
 0x38b   : > { %3294 = vmatpush3.bf16.xpose.msra.mxu1 %v2157_v15  ;;  %3300 = vmatpush3.bf16.xpose.msra.mxu0 %v2203_v45 }
 0x38c   : > { %3295 = vmatprep.mubr.msk.bf16.mxu1 %vm3527_vm1, %v3526_v3  ;;  %3301 = vmatprep.mubr.msk.bf16.mxu0 %vm3527_vm1, %v3526_v3 }
 0x38d   : > { %3305 = vmatprep.subr.bf16.mxu1 %v3526_v3  ;;  %3311 = vmatprep.subr.bf16.mxu0 %v3526_v3 }
 0x392   : > { %3296 = vmatmul.mubr.msk.bf16.vlgmr.msra.gmra.mrb[20].mxu1 %vm1030_vm3, %v1749_v18  ;;  %3302 = vmatmul.mubr.msk.bf16.vlgmr.msra.gmra.mrb[24].mxu0 %vm1030_vm3, %v1750_v20 }
 0x393   : > { %3307 = vmatprep.mubr.msk.bf16.mxu1 %vm3527_vm1, %v3526_v3  ;;  %3313 = vmatprep.mubr.msk.bf16.mxu0 %vm3527_vm1, %v3526_v3 }
 0x444   : > { %v3919_v22 = vpop.f32.mrb[8].mxu1 }
 0x445   : > { %v3921_v23 = vpop.f32.mrb[12].mxu0  ;;  %v3261_v24 = vpop.f32.mrb[9].mxu1 }
 0x446   : > { %v3267_v25 = vpop.f32.mrb[13].mxu0  ;;  %v1299_v26 = vpop.f32.mrb[10].mxu1 }
 0x447   : > { %v1345_v28 = vpop.f32.mrb[14].mxu0  ;;  %v3262_v29 = vpop.f32.mrb[11].mxu1 }
 0x448   : > { %v3268_v33 = vpop.f32.mrb[15].mxu0 }
 0x44d   : > { %v3923_v34 = vpop.f32.mrb[12].mxu1 }
 0x44e   : > { %v3925_v35 = vpop.f32.mrb[16].mxu0  ;;  %v3273_v36 = vpop.f32.mrb[13].mxu1 }
 0x44f   : > { %v3279_v39 = vpop.f32.mrb[17].mxu0  ;;  %v1391_v40 = vpop.f32.mrb[14].mxu1 }
 0x450   : > { %v1437_v60 = vpop.f32.mrb[18].mxu0  ;;  %v3274_v41 = vpop.f32.mrb[15].mxu1 }
 0x451   : > { %v3280_v61 = vpop.f32.mrb[19].mxu0 }
 0x45d   : > { %v2101_v46 = vpop.f32.mrb[16].mxu1  ;;  %v2147_v47 = vpop.f32.mrb[20].mxu0 }
 0x45e   : > { %v2102_v48 = vadd.f32 %v2101_v46, %v2059_v43  ;;  %v2148_v13 = vadd.f32 %v2147_v47, %v2059_v43  ;;  %v3285_v49 = vpop.f32.mrb[17].mxu1  ;;  %v3291_v50 = vpop.f32.mrb[21].mxu0 }
 0x45f   : > { %v2104_v51 = vpop.f32.mrb[18].mxu1  ;;  %v2150_v62 = vpop.f32.mrb[22].mxu0 }
 0x460   : > { %v3286_v52 = vpop.f32.mrb[19].mxu1  ;;  %v3292_v53 = vpop.f32.mrb[23].mxu0  ;;  %v2245_v54 = vsel %vm1030_vm3, %v2102_v48, -inf  ;;  %v2248_v55 = vsel %vm1030_vm3, %v2148_v13, -inf }
 0x461   : > { %2246 = vmax.xlane.f32.xlu0 %v2245_v54  ;;  %2249 = vmax.xlane.f32.xlu1 %v2248_v55 }
 0x465   : > { %v2193_v56 = vpop.f32.mrb[20].mxu1  ;;  %v2239_v57 = vpop.f32.mrb[24].mxu0 }
 0x466   : > { %v3297_v58 = vpop.f32.mrb[21].mxu1  ;;  %v3303_v0 = vpop.f32.mrb[25].mxu0  ;;  %v3938_v5 = vadd.f32 %v2193_v56, %v2059_v43  ;;  %v3940_v6 = vadd.f32 %v2239_v57, %v2059_v43 }
 0x467   : > { %v2196_v1 = vpop.f32.mrb[22].mxu1  ;;  %v2242_v2 = vpop.f32.mrb[26].mxu0 }
 0x468   : > { %v3298_v37 = vpop.f32.mrb[23].mxu1  ;;  %v3304_v44 = vpop.f32.mrb[27].mxu0  ;;  %v2251_v7 = vsel %vm1030_vm3, %v3938_v5, -inf  ;;  %v2254_v8 = vsel %vm1030_vm3, %v3940_v6, -inf }
 0x472   : > { %1909 = vrot.lane.b32.xlu1 %v3737_v32, %s3534_s22  ;;  %v1245_v32 = vsel %vm1030_vm3, %v3868_v30, 0.0 }
 0x477   : > { %1907 = vrot.lane.b32.xlu0 %v3727_v14, %s3534_s22  ;;  %v1242_v14 = vsel %vm1030_vm3, %v3847_v4, 0.0 }
 0x496   : > { %2252 = vmax.xlane.f32.xlu0 %v2251_v7  ;;  %2255 = vmax.xlane.f32.xlu1 %v2254_v8 }
 0x49a   : > { %1240 = vadd.xlane.f32.xlu0 %v1239_v9  ;;  %1246 = vadd.xlane.f32.xlu1 %v1245_v32 }
 0x49e   : > { %1243 = vadd.xlane.f32.xlu0 %v1242_v14 }
 0x4a2   : > { %1249 = vadd.xlane.f32.xlu0 %v1248_v10 }
 0x4ee   : > { %v2247_v15 = vpop.xlane.xlu0 %2246  ;;  %v2250_v45 = vpop.xlane.xlu1 %2249 }
 0x4ef   : > { %v2257_v16 = vsub.f32 %v2102_v48, %v2247_v15  ;;  %v2258_v17 = vsub.f32 %v2148_v13, %v2250_v45 }
 0x4f1   : > { %v2261_v59 = vmul.f32 1.442695, %v2257_v16  ;;  %v2263_v18 = vmul.f32 1.442695, %v2258_v17 }
 0x4f2   : > { %v1908_v20 = vpop.permute.xlu0 %1907  ;;  %v1910_v30 = vpop.permute.xlu1 %1909 }
 0x4f3   : > { %3434 = vpow2.f32 %v2261_v59  ;;  %v1915_v24 = vcombine.low %v1904_v11, %v1908_v20  ;;  %v1916_v25 = vcombine.high %v1904_v11, %v1908_v20  ;;  %v1931_v26 = vcombine.low %v1906_v12, %v1910_v30 }
 0x4f4   : > { %3436 = vpow2.f32 %v2263_v18  ;;  %v1932_v4 = vcombine.high %v1906_v12, %v1910_v30 }
 0x4f5   : > { %v1923_v28 = vrot.slane %v1915_v24, %v3681_v27  ;;  %v1930_v38 = vrot.slane %v1916_v25, %v3681_v27  ;;  %v1939_v29 = vrot.slane %v1931_v26, %v3681_v27 }
 0x4f6   : > { %v1946_v33 = vrot.slane %v1932_v4, %v3681_v27 }
 0x4f7   : > { %v1947_v36 = vcombine.low %v1923_v28, %v1939_v29  ;;  %v1948_v39 = vcombine.high %v1923_v28, %v1939_v29 }
 0x4f8   : > { %v1963_v40 = vcombine.low %v1930_v38, %v1946_v33  ;;  %v1964_v60 = vcombine.high %v1930_v38, %v1946_v33 }
 0x4f9   : > { %v1955_v41 = vrot.slane %v1947_v36, %v3686_v31  ;;  %v1962_v61 = vrot.slane %v1948_v39, %v3686_v31 }
 0x4fa   : > { %v1971_v42 = vrot.slane %v1963_v40, %v3686_v31  ;;  %v1978_v19 = vrot.slane %v1964_v60, %v3686_v31 }
 0x4fb   : > { %v1983_v43 = vcombine.low %v1955_v41, %v1962_v61  ;;  %v3146_v46 = vcombine.high %v1955_v41, %v1962_v61 }
 0x4fc   : > { %v1999_v47 = vcombine.low %v1971_v42, %v1978_v19  ;;  %v3147_v48 = vcombine.high %v1971_v42, %v1978_v19 }
 0x4fd   : > { %v3435_v13 = vpop.eup %3434  ;;  %v1990_v49 = vrot.slane %v1983_v43, %v3681_v27  ;;  %v1998_v50 = vrot.slane %v3146_v46, %v3681_v27 }
 0x4fe   : > { %v3437_v51 = vpop.eup %3436  ;;  %v2006_v62 = vrot.slane %v1999_v47, %v3681_v27  ;;  %v2014_v52 = vrot.slane %v3147_v48, %v3681_v27  ;;  %v2269_v53 = vsel %vm1030_vm3, %v3435_v13, 0.0  ;;  %v2281_v45 = vpack.c.bf16 %v3435_v13, %v3435_v13 }
 0x4ff   : > { %v2272_v54 = vsel %vm1030_vm3, %v3437_v51, 0.0  ;;  %2270 = vadd.xlane.f32.xlu1 %v2269_v53  ;;  %v2015_v55 = vcombine.low %v1990_v49, %v1998_v50  ;;  %v2016_v56 = vcombine.high %v1990_v49, %v1998_v50  ;;  %v2282_v16 = vpack.c.bf16 %v3437_v51, %v3437_v51 }
 0x500   : > { %2273 = vadd.xlane.f32.xlu0 %v2272_v54  ;;  %v2031_v57 = vcombine.low %v2006_v62, %v2014_v52  ;;  %v2032_v58 = vcombine.high %v2006_v62, %v2014_v52 }
 0x501   : > { %v2023_v0 = vrot.slane %v2015_v55, %v3686_v31  ;;  %v2030_v1 = vrot.slane %v2016_v56, %v3686_v31 }
 0x502   : > { %v2039_v2 = vrot.slane %v2031_v57, %v3686_v31  ;;  %v2046_v37 = vrot.slane %v2032_v58, %v3686_v31 }
 0x504   : > { %v2047_v44 = vcombine.low %v2023_v0, %v2039_v2  ;;  %v2048_v7 = vcombine.high %v2023_v0, %v2039_v2  ;;  %v2049_v8 = vcombine.low %v2030_v1, %v2046_v37  ;;  %v2050_v9 = vcombine.high %v2030_v1, %v2046_v37 }
 0x506   : > { %v2051_v32 = vpack.c.bf16 %v2047_v44, %v2047_v44  ;;  %v2052_v14 = vpack.c.bf16 %v2048_v7, %v2048_v7  ;;  %v2053_v12 = vpack.c.bf16 %v2049_v8, %v2049_v8  ;;  %v2054_v15 = vpack.c.bf16 %v2050_v9, %v2050_v9 }
 0x508   : > { %v2289_v10 = vsel %vm1258_vm4, %v2051_v32, 0  ;;  %v2335_v11 = vsel %vm1258_vm4, %v2052_v14, 0  ;;  %v2381_v17 = vsel %vm1258_vm4, %v2053_v12, 0  ;;  %v2427_v59 = vsel %vm1258_vm4, %v2054_v15, 0 }
 0x509   : > { %3306 = vmatpush3.bf16.msra.mxu1 %v2289_v10  ;;  %3312 = vmatpush3.bf16.msra.mxu0 %v2335_v11 }
 0x50a   : > { %3317 = vmatprep.subr.bf16.mxu1 %v3526_v3  ;;  %3323 = vmatprep.subr.bf16.mxu0 %v3526_v3 }
 0x50c   : > { %3308 = vmatmul.mubr.msk.bf16.vlgmr.msra.gmra.mrb[24].mxu1 %vm1030_vm3, %v2281_v45  ;;  %3314 = vmatmul.mubr.msk.bf16.vlgmr.msra.gmra.mrb[28].mxu0 %vm1030_vm3, %v2282_v16 }
 0x50d   : > { %3318 = vmatpush3.bf16.msra.mxu1 %v2381_v17  ;;  %3324 = vmatpush3.bf16.msra.mxu0 %v2427_v59 }
 0x50e   : > { %3319 = vmatprep.mubr.msk.bf16.mxu1 %vm3527_vm1, %v3526_v3  ;;  %3325 = vmatprep.mubr.msk.bf16.mxu0 %vm3527_vm1, %v3526_v3 }
 0x50f   : > { %3329 = vmatprep.subr.bf16.mxu1 %v3526_v3  ;;  %3337 = vmatprep.subr.bf16.mxu0 %v3526_v3 }
 0x523   : > { %v2253_v18 = vpop.xlane.xlu0 %2252  ;;  %v2256_v20 = vpop.xlane.xlu1 %2255 }
 0x524   : > { %v2259_v30 = vsub.f32 %v3938_v5, %v2253_v18  ;;  %v2260_v24 = vsub.f32 %v3940_v6, %v2256_v20 }
 0x526   : > { %v2265_v25 = vmul.f32 1.442695, %v2259_v30  ;;  %v2267_v26 = vmul.f32 1.442695, %v2260_v24 }
 0x527   : > { %v1241_v4 = vpop.xlane.xlu0 %1240  ;;  %v1247_v28 = vpop.xlane.xlu1 %1246 }
 0x528   : > { %3438 = vpow2.f32 %v2265_v25 }
 0x529   : > { %3440 = vpow2.f32 %v2267_v26 }
 0x52a   : > { %3442 = vrcp.f32 %v1241_v4 }
 0x52b   : > { %3444 = vrcp.f32 %v1247_v28  ;;  %v1244_v38 = vpop.xlane.xlu0 %1243 }
 0x52c   : > { %3446 = vrcp.f32 %v1244_v38 }
 0x52f   : > { %v1250_v29 = vpop.xlane.xlu0 %1249 }
 0x530   : > { %3448 = vrcp.f32 %v1250_v29 }
 0x532   : > { %v3439_v33 = vpop.eup %3438 }
 0x533   : > { %v3441_v36 = vpop.eup %3440  ;;  %v2275_v39 = vsel %vm1030_vm3, %v3439_v33, 0.0  ;;  %v2283_v40 = vpack.c.bf16 %v3439_v33, %v3439_v33 }
 0x534   : > { %v3443_v5 = vpop.eup %3442  ;;  %2276 = vadd.xlane.f32.xlu1 %v2275_v39  ;;  %v2278_v6 = vsel %vm1030_vm3, %v3441_v36, 0.0  ;;  %v2284_v60 = vpack.c.bf16 %v3441_v36, %v3441_v36 }
 0x535   : > { %v3445_v41 = vpop.eup %3444  ;;  %v1444_v61 = vmul.f32 %v3443_v5, %v3919_v22  ;;  %2279 = vadd.xlane.f32.xlu0 %v2278_v6  ;;  %3320 = vmatmul.mubr.msk.bf16.vlgmr.msra.gmra.mrb[28].mxu1 %vm1030_vm3, %v2283_v40 }
 0x536   : > { %v1446_v42 = vmul.f32 %v3445_v41, %v3923_v34  ;;  %3326 = vmatmul.mubr.msk.bf16.vlgmr.msra.gmra.mrb[32].mxu0 %vm1030_vm3, %v2284_v60  ;;  %3333 = vmatprep.mubr.msk.bf16.mxu1 %vm3527_vm1, %v3526_v3  ;;  %v3447_v19 = vpop.eup %3446 }
 0x537   : > { %3341 = vmatprep.mubr.msk.bf16.mxu0 %vm3527_vm1, %v3526_v3  ;;  %v1445_v48 = vmul.f32 %v3447_v19, %v3921_v23 }
 0x538   : > { %v1448_v43 = vcombine.low %v1444_v61, %v1446_v42  ;;  %v1449_v46 = vcombine.high %v1444_v61, %v1446_v42 }
 0x53a   : > { %v3449_v47 = vpop.eup %3448  ;;  %v1456_v34 = vrot.slane %v1448_v43, %v3681_v27  ;;  %v1463_v50 = vrot.slane %v1449_v46, %v3681_v27 }
 0x53b   : > { %v1447_v22 = vmul.f32 %v3449_v47, %v3925_v35 }
 0x53d   : > { %v1464_v13 = vcombine.low %v1445_v48, %v1447_v22  ;;  %v1465_v49 = vcombine.high %v1445_v48, %v1447_v22 }
 0x53f   : > { %v1472_v51 = vrot.slane %v1464_v13, %v3681_v27  ;;  %v1479_v62 = vrot.slane %v1465_v49, %v3681_v27 }
 0x541   : > { %v1480_v52 = vcombine.low %v1456_v34, %v1472_v51  ;;  %v1481_v53 = vcombine.high %v1456_v34, %v1472_v51  ;;  %v1496_v54 = vcombine.low %v1463_v50, %v1479_v62  ;;  %v1497_v55 = vcombine.high %v1463_v50, %v1479_v62 }
 0x543   : > { %v1488_v56 = vrot.slane %v1480_v52, %v3686_v31  ;;  %v1495_v23 = vrot.slane %v1481_v53, %v3686_v31  ;;  %v1504_v35 = vrot.slane %v1496_v54, %v3686_v31  ;;  %v1511_v57 = vrot.slane %v1497_v55, %v3686_v31 }
 0x545   : > { %v1516_v58 = vcombine.low %v1488_v56, %v1495_v23  ;;  %v3140_v0 = vcombine.high %v1488_v56, %v1495_v23  ;;  %v1532_v1 = vcombine.low %v1504_v35, %v1511_v57  ;;  %v3141_v2 = vcombine.high %v1504_v35, %v1511_v57 }
 0x547   : > { %v1523_v37 = vrot.slane %v1516_v58, %v3681_v27  ;;  %v1531_v44 = vrot.slane %v3140_v0, %v3681_v27  ;;  %v1539_v7 = vrot.slane %v1532_v1, %v3681_v27  ;;  %v1547_v8 = vrot.slane %v3141_v2, %v3681_v27 }
 0x549   : > { %v1549_v9 = vcombine.high %v1523_v37, %v1531_v44  ;;  %v1565_v32 = vcombine.high %v1539_v7, %v1547_v8  ;;  %v1548_v14 = vcombine.low %v1523_v37, %v1531_v44  ;;  %v1564_v10 = vcombine.low %v1539_v7, %v1547_v8 }
 0x54b   : > { %v4013_v11 = vrot.slane %v1549_v9, %v3686_v31  ;;  %v4016_v12 = vrot.slane %v1565_v32, %v3686_v31  ;;  %v4019_v15 = vrot.slane %v1548_v14, %v3686_v31  ;;  %v4022_v45 = vrot.slane %v1564_v10, %v3686_v31  ;;  %v3418_v32 = vld [vmem:[%s3626_s24] sm:$0xff]  }
 0x54c   : > { %3330 = vmatpush3.bf16.msra.mxu1 %v3418_v32  ;;  %v3421_v32 = vld [vmem:[%s3631_s27 + $0x8] sm:$0xff]  }
 0x54d   : > { %v1582_v16 = vcombine.low %v4013_v11, %v4016_v12  ;;  %v1580_v17 = vcombine.low %v4019_v15, %v4022_v45  ;;  %v1581_v59 = vcombine.high %v4019_v15, %v4022_v45  ;;  %v1583_v18 = vcombine.high %v4013_v11, %v4016_v12  ;;  %3331 = vmatprep.subr.bf16.mxu1 %v3526_v3  ;;  %v4071_v15 = vld [vmem:[%s3647_s23] sm:$0x3f] }
 0x54e   : > { %v2637_v45 = vrot.slane %v4071_v15, %v3805_v63 }
 0x58c   : > { %v2271_v29 = vpop.xlane.xlu1 %2270 }
 0x58d   : > { %v2274_v33 = vpop.xlane.xlu0 %2273  ;;  %3450 = vrcp.f32 %v2271_v29 }
 0x58e   : > { %3452 = vrcp.f32 %v2274_v33 }
 0x597   : > { %v3451_v40 = vpop.eup %3450 }
 0x598   : > { %v3453_v5 = vpop.eup %3452 }
 0x5c1   : > { %v2277_v36 = vpop.xlane.xlu1 %2276 }
 0x5c2   : > { %v2280_v39 = vpop.xlane.xlu0 %2279  ;;  %3454 = vrcp.f32 %v2277_v36 }
 0x5c3   : > { %3456 = vrcp.f32 %v2280_v39 }
 0x5cc   : > { %v3455_v6 = vpop.eup %3454 }
 0x5cd   : > { %v3457_v41 = vpop.eup %3456 }
 0x5df   : > { %v2325_v20 = vpop.f32.mrb[24].mxu1  ;;  %v2371_v30 = vpop.f32.mrb[28].mxu0 }
 0x5e0   : > { %v3309_v24 = vpop.f32.mrb[25].mxu1  ;;  %v3315_v25 = vpop.f32.mrb[29].mxu0  ;;  %v2473_v61 = vmul.f32 %v3451_v40, %v2325_v20  ;;  %v2474_v46 = vmul.f32 %v3453_v5, %v2371_v30 }
 0x5e1   : > { %v2328_v26 = vpop.f32.mrb[26].mxu1  ;;  %v2374_v4 = vpop.f32.mrb[30].mxu0 }
 0x5e2   : > { %v3310_v28 = vpop.f32.mrb[27].mxu1  ;;  %v3316_v38 = vpop.f32.mrb[31].mxu0 }
 0x5e3   : > { %v3419_v28 = vld [vmem:[%s3626_s24 + $0x8] sm:$0xff]   ;;  %s3535_s24 = smov 16  }
 0x5e4   : > { %3332 = vmatpush3.bf16.msra.mxu1 %v3419_v28  ;;  %v2731_v28 = vsub.s32 2, %v3677_v21 }
 0x5e5   : > { %3345 = vmatprep.subr.bf16.mxu1 %v3526_v3 }
 0x608   : > { %v2417_v60 = vpop.f32.mrb[28].mxu1 }
 0x609   : > { %v2475_v42 = vmul.f32 %v3455_v6, %v2417_v60  ;;  %v2463_v19 = vpop.f32.mrb[32].mxu0  ;;  %v3321_v43 = vpop.f32.mrb[29].mxu1 }
 0x60a   : > { %v2476_v47 = vmul.f32 %v3457_v41, %v2463_v19  ;;  %v3327_v48 = vpop.f32.mrb[33].mxu0  ;;  %v2420_v22 = vpop.f32.mrb[30].mxu1 }
 0x60b   : > { %v2477_v13 = vcombine.low %v2473_v61, %v2475_v42  ;;  %v2478_v49 = vcombine.high %v2473_v61, %v2475_v42  ;;  %v2466_v34 = vpop.f32.mrb[34].mxu0  ;;  %v3322_v50 = vpop.f32.mrb[31].mxu1 }
 0x60c   : > { %v2493_v51 = vcombine.low %v2474_v46, %v2476_v47  ;;  %v2494_v62 = vcombine.high %v2474_v46, %v2476_v47  ;;  %v3328_v52 = vpop.f32.mrb[35].mxu0 }
 0x60d   : > { %v2485_v53 = vrot.slane %v2477_v13, %v3681_v27  ;;  %v2492_v54 = vrot.slane %v2478_v49, %v3681_v27 }
 0x60e   : > { %v2501_v55 = vrot.slane %v2493_v51, %v3681_v27  ;;  %v2508_v56 = vrot.slane %v2494_v62, %v3681_v27 }
 0x610   : > { %v2509_v23 = vcombine.low %v2485_v53, %v2501_v55  ;;  %v2510_v35 = vcombine.high %v2485_v53, %v2501_v55  ;;  %v2525_v57 = vcombine.low %v2492_v54, %v2508_v56  ;;  %v2526_v58 = vcombine.high %v2492_v54, %v2508_v56  ;;  %v3470_v53 = vld [vmem:[#allocation2] sm:$0xff]  ;;  %v3471_v56 = vld [vmem:[#allocation2 + $0x8] sm:$0xff] }
 0x612   : > { %v2517_v0 = vrot.slane %v2509_v23, %v3686_v31  ;;  %v2524_v1 = vrot.slane %v2510_v35, %v3686_v31  ;;  %v2533_v2 = vrot.slane %v2525_v57, %v3686_v31  ;;  %v2540_v37 = vrot.slane %v2526_v58, %v3686_v31 }
 0x614   : > { %v2545_v44 = vcombine.low %v2517_v0, %v2524_v1  ;;  %v3156_v7 = vcombine.high %v2517_v0, %v2524_v1  ;;  %v2561_v8 = vcombine.low %v2533_v2, %v2540_v37  ;;  %v3157_v9 = vcombine.high %v2533_v2, %v2540_v37 }
 0x616   : > { %v2552_v14 = vrot.slane %v2545_v44, %v3681_v27  ;;  %v2560_v10 = vrot.slane %v3156_v7, %v3681_v27  ;;  %v2568_v20 = vrot.slane %v2561_v8, %v3681_v27  ;;  %v2576_v30 = vrot.slane %v3157_v9, %v3681_v27  ;;  %v3420_v9 = vld [vmem:[%s3631_s27] sm:$0xff]  }
 0x617   : > { %3338 = vmatpush3.bf16.msra.mxu0 %v3420_v9 }
 0x618   : > { %v2578_v24 = vcombine.high %v2552_v14, %v2560_v10  ;;  %v2594_v25 = vcombine.high %v2568_v20, %v2576_v30  ;;  %v2577_v26 = vcombine.low %v2552_v14, %v2560_v10  ;;  %v2593_v4 = vcombine.low %v2568_v20, %v2576_v30  ;;  %3339 = vmatprep.subr.bf16.mxu0 %v3526_v3 }
 0x61a   : > { %v2592_v38 = vrot.slane %v2578_v24, %v3686_v31  ;;  %v2608_v29 = vrot.slane %v2594_v25, %v3686_v31  ;;  %v2585_v33 = vrot.slane %v2577_v26, %v3686_v31  ;;  %v2601_v36 = vrot.slane %v2593_v4, %v3686_v31 }
 0x61b   : > { %3340 = vmatpush3.bf16.msra.mxu0 %v3421_v32  ;;  %v2725_v26 = vsub.s32 1, %v3677_v21 }
 0x61c   : > { %v2611_v39 = vcombine.low %v2592_v38, %v2608_v29  ;;  %v2610_v40 = vcombine.high %v2585_v33, %v2601_v36  ;;  %v2609_v27 = vcombine.low %v2585_v33, %v2601_v36  ;;  %v2612_v5 = vcombine.high %v2592_v38, %v2608_v29 }
 0x61d   : > { %v2726_v4 = vrot.slane %v4071_v15, %v2725_v26 }
 0x61e   : > { %v3406_v6 = vpack.i.bf16 %v2611_v39, %v1582_v16  ;;  %v3401_v60 = vpack.i.bf16 %v2610_v40, %v1581_v59  ;;  %v3411_v41 = vpack.i.bf16 %v2612_v5, %v1583_v18  ;;  %v2732_v40 = vrot.slane %v4071_v15, %v2731_v28 }
 0x620   : > { %3407 = vrot.lane.b32.xlu0 %v3406_v6, %s3535_s24  ;;  %3402 = vrot.lane.b32.xlu1 %v3401_v60, %s3536_s13 }
 0x624   : > { %3412 = vrot.lane.b32.xlu1 %v3411_v41, %s3537_s18  ;;  %v3422_v41 = vld [vmem:[%s3642_s19] sm:$0xff]  }
 0x692   : > { %v3408_v31 = vpop.permute.xlu0 %3407  ;;  %v3403_v61 = vpop.permute.xlu1 %3402 }
 0x693   : > { %v3405_v42 = vunpack.i.h.bf16 %v3403_v61  ;;  %v3404_v19 = vunpack.i.l.bf16 %v3403_v61  ;;  %v3410_v16 = vunpack.i.h.bf16 %v3408_v31  ;;  %v3409_v43 = vunpack.i.l.bf16 %v3408_v31  ;;  %v3423_v31 = vld [vmem:[%s3642_s19 + $0x8] sm:$0xff]   ;;  %v3424_v61 = vld [vmem:[%s3642_s19 + $0x10] sm:$0xff]  }
 0x695   : > { %v1596_v11 = vsel %vm1030_vm3, %v1580_v17, %v3404_v19  ;;  %v2625_v12 = vsel %vm1030_vm3, %v2609_v27, %v3405_v42  ;;  %v3425_v42 = vld [vmem:[%s3642_s19 + $0x18] sm:$0xff]   ;;  %v3161_v19 = vld [vmem:[%s472_s12] ss:$0 sm:$0xff] }
 0x696   : > { %v3413_v59 = vpop.permute.xlu1 %3412  ;;  %v1598_v47 = vsel %vm1597_vm7, %v1596_v11, %v3409_v43  ;;  %v2626_v48 = vsel %vm1597_vm7, %v2625_v12, %v3410_v16 }
 0x697   : > { %v3415_v18 = vunpack.i.h.bf16 %v3413_v59  ;;  %v3414_v46 = vunpack.i.l.bf16 %v3413_v59 }
 0x699   : > { %v1600_v22 = vsel %vm1599_vm8, %v1598_v47, %v3414_v46  ;;  %v2627_v13 = vsel %vm1599_vm8, %v2626_v48, %v3415_v18 }
 0x69a   : > { %v2629_v49 = vpack.c.bf16 %v2627_v13, %v1600_v22 }
 0x69c   : > { %3334 = vmatmul.mubr.msk.bf16.vlgmr.msra.gmra.mrb[32].mxu1 %vm519_vm2, %v2629_v49 }
 0x69d   : > { %3353 = vmatprep.mubr.msk.bf16.mxu1 %vm3527_vm1, %v3526_v3  ;;  %3346 = vmatpush3.bf16.msra.mxu1 %v3422_v41 }
 0x69e   : > { %3347 = vmatprep.subr.bf16.mxu1 %v3526_v3 }
 0x6a1   : > { %3348 = vmatpush3.bf16.msra.mxu1 %v3423_v31 }
 0x6a2   : > { %3349 = vmatprep.subr.bf16.mxu1 %v3526_v3 }
 0x6a5   : > { %3350 = vmatpush3.bf16.msra.mxu1 %v3424_v61 }
 0x6a6   : > { %3351 = vmatprep.subr.bf16.mxu1 %v3526_v3 }
 0x6a9   : > { %3352 = vmatpush3.bf16.msra.mxu1 %v3425_v42 }
 0x76f   : > { %v2687_v17 = vpop.f32.mrb[32].mxu1 }
 0x770   : > { %v2688_v34 = vadd.f32 %v2687_v17, %v2637_v45  ;;  %v3335_v50 = vpop.f32.mrb[33].mxu1 }
 0x771   : > { %v2690_v51 = vpop.f32.mrb[34].mxu1 }
 0x772   : > { %v2691_v62 = vadd.f32 %v2690_v51, %v2637_v45  ;;  %v3336_v52 = vpop.f32.mrb[35].mxu1  ;;  %v2694_v54 = vadd.f32 %v3470_v53, %v2688_v34 }
 0x774   : > { %v2696_v55 = vsel %vm519_vm2, %v2694_v54, 0.0  ;;  %v2695_v23 = vadd.f32 %v3471_v56, %v2691_v62 }
 0x775   : > { %2697 = vadd.xlane.f32.xlu1 %v2696_v55 }
 0x776   : > { %v2699_v35 = vsel %vm519_vm2, %v2695_v23, 0.0 }
 0x777   : > { %2700 = vadd.xlane.f32.xlu0 %v2699_v35  ;;  %v2832_v35 = vsub.s32 3, %v3677_v21 }
 0x802   : > { %v2698_v57 = vpop.xlane.xlu1 %2697 }
 0x803   : > { %v2703_v63 = vmul.f32 0.03125, %v2698_v57  ;;  %v2833_v57 = vrot.slane %v4071_v15, %v2832_v35 }
 0x804   : > { %v2701_v58 = vpop.xlane.xlu0 %2700 }
 0x805   : > { %v2705_v0 = vsub.f32 %v2694_v54, %v2703_v63  ;;  %v2704_v1 = vmul.f32 0.03125, %v2701_v58 }
 0x807   : > { %v2706_v2 = vsub.f32 %v2695_v23, %v2704_v1  ;;  %v2707_v37 = vmul.f32 %v2705_v0, %v2705_v0 }
 0x809   : > { %v2709_v44 = vsel %vm519_vm2, %v2707_v37, 0.0  ;;  %v2708_v7 = vmul.f32 %v2706_v2, %v2706_v2 }
 0x80a   : > { %2710 = vadd.xlane.f32.xlu0 %v2709_v44 }
 0x80b   : > { %v2712_v8 = vsel %vm519_vm2, %v2708_v7, 0.0 }
 0x80c   : > { %2713 = vadd.xlane.f32.xlu1 %v2712_v8 }
 0x897   : > { %v2711_v14 = vpop.xlane.xlu0 %2710 }
 0x898   : > { %v2715_v10 = vmul.f32 0.03125, %v2711_v14 }
 0x899   : > { %v2714_v20 = vpop.xlane.xlu1 %2713 }
 0x89a   : > { %v2717_v30 = vadd.f32 1e-12, %v2715_v10  ;;  %v2716_v24 = vmul.f32 0.03125, %v2714_v20 }
 0x89c   : > { %3458 = vrsqrt.f32 %v2717_v30  ;;  %v2718_v25 = vadd.f32 1e-12, %v2716_v24 }
 0x89e   : > { %3460 = vrsqrt.f32 %v2718_v25 }
 0x8a6   : > { %v3459_v38 = vpop.eup %3458 }
 0x8a7   : > { %v2721_v29 = vmul.f32 %v3459_v38, %v2705_v0 }
 0x8a8   : > { %v3461_v33 = vpop.eup %3460 }
 0x8a9   : > { %v2727_v36 = vmul.f32 %v2726_v4, %v2721_v29  ;;  %v2722_v39 = vmul.f32 %v3461_v33, %v2706_v2 }
 0x8ab   : > { %v2728_v27 = vmul.f32 %v2726_v4, %v2722_v39  ;;  %v2733_v5 = vadd.f32 %v2732_v40, %v2727_v36 }
 0x8ad   : > { %v2734_v6 = vadd.f32 %v2732_v40, %v2728_v27  ;;  %v2933_v27 = vsub.s32 4, %v3677_v21 }
 0x8af   : > { %v2735_v60 = vpack.c.bf16 %v2734_v6, %v2733_v5 }
 0x8b1   : > { %3342 = vmatmul.mubr.msk.bf16.vlgmr.msra.gmra.mrb[36].mxu0 %vm519_vm2, %v2735_v60 }
 0x984   : > { %v2796_v16 = vpop.f32.mrb[36].mxu0 }
 0x985   : > { %v2797_v43 = vadd.f32 %v3161_v19, %v2796_v16  ;;  %v3343_v11 = vpop.f32.mrb[37].mxu0 }
 0x986   : > { %v2799_v12 = vpop.f32.mrb[38].mxu0 }
 0x987   : > { %v2805_v59 = vmul.f32 0.044715, %v2797_v43  ;;  %v2800_v18 = vadd.f32 %v3161_v19, %v2799_v12  ;;  %v3344_v46 = vpop.f32.mrb[39].mxu0  ;;  %v2803_v52 = vmul.f32 0.5, %v2797_v43 }
 0x989   : > { %v2807_v47 = vmul.f32 %v2805_v59, %v2797_v43  ;;  %v2806_v48 = vmul.f32 0.044715, %v2800_v18  ;;  %v2804_v53 = vmul.f32 0.5, %v2800_v18 }
 0x98b   : > { %v2809_v22 = vmul.f32 %v2807_v47, %v2797_v43  ;;  %v2808_v13 = vmul.f32 %v2806_v48, %v2800_v18 }
 0x98d   : > { %v2811_v49 = vadd.f32 %v2809_v22, %v2797_v43  ;;  %v2810_v45 = vmul.f32 %v2808_v13, %v2800_v18 }
 0x98f   : > { %v2813_v3 = vmul.f32 0.7978846, %v2811_v49  ;;  %v2812_v17 = vadd.f32 %v2810_v45, %v2800_v18 }
 0x991   : > { %3462 = vtanh.f32 %v2813_v3  ;;  %v2814_v34 = vmul.f32 0.7978846, %v2812_v17 }
 0x993   : > { %3464 = vtanh.f32 %v2814_v34 }
 0x99b   : > { %v3463_v50 = vpop.eup %3462 }
 0x99c   : > { %v2817_v51 = vadd.f32 1.0, %v3463_v50 }
 0x99d   : > { %v3465_v62 = vpop.eup %3464 }
 0x99e   : > { %v2818_v54 = vadd.f32 1.0, %v3465_v62  ;;  %v2819_v55 = vmul.f32 %v2817_v51, %v2803_v52 }
 0x9a0   : > { %v2820_v56 = vmul.f32 %v2818_v54, %v2804_v53 }
 0x9a2   : > { %v2821_v23 = vpack.c.bf16 %v2820_v56, %v2819_v55 }
 0x9a4   : > { %3354 = vmatmul.mubr.msk.bf16.vlgmr.msra.gmra.mrb[36].mxu1 %vm2858_vm9, %v2821_v23 }
 0xa77   : > { %v2896_v63 = vpop.f32.mrb[36].mxu1 }
 0xa78   : > { %v2897_v58 = vadd.f32 %v2896_v63, %v2833_v57  ;;  %v3355_v0 = vpop.f32.mrb[37].mxu1 }
 0xa79   : > { %v2899_v1 = vpop.f32.mrb[38].mxu1 }
 0xa7a   : > { %v2900_v2 = vadd.f32 %v2899_v1, %v2833_v57  ;;  %v3356_v37 = vpop.f32.mrb[39].mxu1  ;;  %v2903_v44 = vadd.f32 %v2897_v58, %v2733_v5  ;;  %v2939_v5 = vsub.s32 5, %v3677_v21 }
 0xa7c   : > { %v2905_v7 = vsel %vm519_vm2, %v2903_v44, 0.0  ;;  %v2904_v8 = vadd.f32 %v2900_v2, %v2734_v6  ;;  %v2934_v6 = vrot.slane %v4071_v15, %v2933_v27  ;;  %v2940_v41 = vrot.slane %v4071_v15, %v2939_v5 }
 0xa7d   : > { %2906 = vadd.xlane.f32.xlu0 %v2905_v7 }
 0xa7e   : > { %v2908_v9 = vsel %vm519_vm2, %v2904_v8, 0.0 }
 0xa7f   : > { %2909 = vadd.xlane.f32.xlu1 %v2908_v9 }
 0xb0a   : > { %v2907_v32 = vpop.xlane.xlu0 %2906 }
 0xb0b   : > { %v2911_v14 = vmul.f32 0.03125, %v2907_v32 }
 0xb0c   : > { %v2910_v10 = vpop.xlane.xlu1 %2909 }
 0xb0d   : > { %v2913_v20 = vsub.f32 %v2903_v44, %v2911_v14  ;;  %v2912_v30 = vmul.f32 0.03125, %v2910_v10 }
 0xb0f   : > { %v2914_v24 = vsub.f32 %v2904_v8, %v2912_v30  ;;  %v2915_v25 = vmul.f32 %v2913_v20, %v2913_v20 }
 0xb11   : > { %v2917_v26 = vsel %vm519_vm2, %v2915_v25, 0.0  ;;  %v2916_v4 = vmul.f32 %v2914_v24, %v2914_v24 }
 0xb12   : > { %2918 = vadd.xlane.f32.xlu0 %v2917_v26 }
 0xb13   : > { %v2920_v28 = vsel %vm519_vm2, %v2916_v4, 0.0 }
 0xb14   : > { %2921 = vadd.xlane.f32.xlu1 %v2920_v28 }
 0xb9f   : > { %v2919_v38 = vpop.xlane.xlu0 %2918 }
 0xba0   : > { %v2923_v29 = vmul.f32 0.03125, %v2919_v38 }
 0xba1   : > { %v2922_v33 = vpop.xlane.xlu1 %2921 }
 0xba2   : > { %v2925_v36 = vadd.f32 1e-12, %v2923_v29  ;;  %v2924_v39 = vmul.f32 0.03125, %v2922_v33 }
 0xba4   : > { %3466 = vrsqrt.f32 %v2925_v36  ;;  %v2926_v40 = vadd.f32 1e-12, %v2924_v39 }
 0xba6   : > { %3468 = vrsqrt.f32 %v2926_v40 }
 0xbae   : > { %v3467_v60 = vpop.eup %3466 }
 0xbaf   : > { %v2929_v31 = vmul.f32 %v3467_v60, %v2913_v20 }
 0xbb0   : > { %v3469_v61 = vpop.eup %3468 }
 0xbb1   : > { %v2935_v42 = vmul.f32 %v2934_v6, %v2929_v31  ;;  %v2930_v19 = vmul.f32 %v3469_v61, %v2914_v24  ;;  %2948 = sbr.rel (%p3170_p6) target bundleno = 3000 (0xbb8), region = 64 }
 0xbb3   : > { %v2941_v16 = vadd.f32 %v2940_v41, %v2935_v42  ;;  %v2936_v43 = vmul.f32 %v2934_v6, %v2930_v19 }
 0xbb5   : > { %2943 = vst.msk [vmem:[#allocation2] sm:$0xff] %vm519_vm2, %v2941_v16  ;;  %v2942_v11 = vadd.f32 %v2940_v41, %v2936_v43  ;;  %2949 = vst.msk [vmem:[#allocation3] sm:$0xff] (!%p3170_p6), %vm519_vm2, %v2941_v16 }
 0xbb7   : > { %2944 = vst.msk [vmem:[#allocation2 + $0x8] sm:$0xff] %vm519_vm2, %v2942_v11  ;;  %2950 = vst.msk [vmem:[#allocation3 + $0x8] sm:$0xff] (!%p3170_p6), %vm519_vm2, %v2942_v11 }
 0xbb8 PF: > { %s4164_s12 = sadd.s32 4294967295, %s3524_s11   ;;  %s3538_s19 = smov [#allocation3]  }
 0xbb9   : > { %p4116_p7 = scmp.eq.s32.totalorder %s4164_s12, 1  ;;  %s2960_s21 = sshll.u32 %s3538_s19, 4  ;;  %s2961_s21 = int_to_ptr.vmem [resolvable:$true] %s2960_s21 }
 0xbba   : > { %s3472_s29 = scalar_lea.vmem %s2961_s21, 256  ;;  %p3479_p11 = scmp.lt.s32.totalorder %s2961_s21, %s2961_s21 }
 0xbbb   : > { %p3473_p8 = scmp.ne.s32.totalorder %s2961_s21, %s3472_s29  ;;  %p3480_p12 = scmp.lt.s32.totalorder %s3472_s29, %s3472_s29 }
 0xbbd   : > { %p3474_p9 = pnand %p3473_p8, %p4116_p7  ;;  %p3481_p13 = por %p3480_p12, %p3479_p11 }
 0xbbf   : > { %p3475_p10 = pneg %p3474_p9 }
 0xbc1   : > { %p3482_p0 = pnand %p3481_p13, %p3475_p10 }
 0xbc3   : > { %3485 = shalt.err (!%p3482_p0)
}
 0xbc4   : > { %s3486_s17 = scalar_lea.hbm %s4161_s9, 256 }
 0xbc5   : > { %p3487_p1 = scmp.ne.s32.totalorder %s4161_s9, %s3486_s17  ;;  %p3492_p4 = scmp.lt.u32.totalorder %s3486_s17, %s4161_s9 }
 0xbc7   : > { %p3488_p2 = pnand %p3487_p1, %p4116_p7 }
 0xbc9   : > { %p3489_p3 = pneg %p3488_p2 }
 0xbcb   : > { %p3494_p5 = pnand %p3492_p4, %p3489_p3 }
 0xbcd   : > { %3497 = shalt.err (!%p3494_p5)
}
 0xbce   : > { %s3539_s26 = smov 128  }
 0xbcf   : > { %3358 = dma.vmem_to_hbm [thread:$0]  (%p4116_p7), %s2961_s21, 256, %s4161_s9, [#allocation4], %s3539_s26, %s3539_s26, %s3536_s13  }
 0xbd0   : > { %3511 = dma.done.wait (%p4116_p7), [#allocation4], 256  }
 0xbd1   : > { %3513 = vsyncadd (%p4116_p7), [#allocation4], 4294967040 }
 0xbd2 PF: > { %s20_s11 = sadd.s32 1, %s3524_s11   ;;  %s4166_s18 = sld [smem:[#allocation6_spill]] }
 0xbd3   : > { %p17_p6 = scmp.ge.s32.totalorder %s20_s11, 4   ;;  %s4167_s30 = smov %s3520_s10 }
 0xbd5   :  { %19 = sbr.rel (!%p17_p6) target bundleno = 2 (0x2), region = 116 }
 0xbd8   : > { %s4168_s10 = smov %s4166_s18 }
 0xbdc   :  { %2976 = vsyncpa [#allocation4], 1 }
 0xbdd   :  { %2978 = vsyncpa [#allocation4 + $0x1], 1 }

</bundles_post_ra>
